<compile_context>
chip_gen: v6e
topology: v6e:2x2x1
jax: 0.10.0
libtpu: 0.0.40
codegen_flags: <defaults>
</compile_context>

<pallas_src>
import math
import functools

import jax
import jax.numpy as jnp
import numpy as np
from jax.experimental import pallas as pl
from jax.experimental.pallas import tpu as pltpu


# ----------------------------- kernel ----------------------------------------

def _layer_norm(x, gamma, beta, eps=1e-5):
    mu = jnp.mean(x, axis=-1, keepdims=True)
    xc = x - mu
    var = jnp.mean(xc * xc, axis=-1, keepdims=True)
    return xc * jax.lax.rsqrt(var + eps) * gamma + beta


def fused_encoder_kernel(x_ref,
                         wqkv_ref, wo_ref, w1_ref, w2_ref,
                         small_ref, fn_ref,
                         o_ref,
                         x_acc, qkv_acc, ctx_acc,
                         *, n_heads, seq_len, batch_tile, d_model, d_ff,
                         apply_final_norm):
    """Whole Informer Encoder for one batch block; grid = (batch_blocks, layers)."""
    layer = pl.program_id(1)
    n_layers = pl.num_programs(1)
    H, L, bt, D, F = n_heads, seq_len, batch_tile, d_model, d_ff
    E = D // H
    scale = 1.0 / math.sqrt(E)
    f32, bf16 = jnp.float32, jnp.bfloat16

    # Load this batch block into the resident f32 accumulator once per batch
    # block (the layer grid axis revisits the same x / output blocks).
    @pl.when(layer == 0)
    def _():
        x_acc[...] = x_ref[...].astype(f32)

    # ---- current layer's parameters ----
    wqkv = wqkv_ref[0]                 # (D, 3D)  bf16
    wo = wo_ref[0]                     # (D, D)   bf16
    w1 = w1_ref[0]                     # (D, F)   bf16
    w2 = w2_ref[0]                     # (F, D)   bf16
    small = small_ref[0]               # (8, W)   f32, packed small params
    bqkv = small[0:1, :3 * D]
    bo = small[1:2, :D]
    b1 = small[2:3, :F]
    b2 = small[3:4, :D]
    g1 = small[4:5, :D]
    be1 = small[5:6, :D]
    g2 = small[6:7, :D]
    be2 = small[7:8, :D]

    def mm(a, w):                      # lane-dense 2-D matmul, bf16 -> f32 acc
        return jnp.dot(a.astype(bf16), w, preferred_element_type=f32)

    x_slab = x_acc[...].reshape(bt * L, D)                     # (bt*L, D) f32

    # ---- lane-dense fused QKV projection over the whole slab ----
    qkv = mm(x_slab, wqkv) + bqkv                              # (bt*L, 3D) f32
    qkv_acc[...] = qkv.reshape(bt, L, 3 * D)

    # ---- per-sequence multi-head attention (scores / softmax / context) ----
    def attn_body(b, carry):
        qkv_b = qkv_acc[b]                                     # (L, 3D) f32
        q = jnp.swapaxes(qkv_b[:, 0 * D:1 * D].reshape(L, H, E), 0, 1)  # (H,L,E)
        k = jnp.swapaxes(qkv_b[:, 1 * D:2 * D].reshape(L, H, E), 0, 1)
        v = jnp.swapaxes(qkv_b[:, 2 * D:3 * D].reshape(L, H, E), 0, 1)

        s = jnp.einsum('hle,hse->hls', q.astype(bf16), k.astype(bf16),
                       preferred_element_type=f32) * scale     # (H, L, L) f32
        s = s - jnp.max(s, axis=-1, keepdims=True)
        p = jnp.exp(s)
        p = p * pl.reciprocal(jnp.sum(p, axis=-1, keepdims=True))   # exact

        ctx = jnp.einsum('hls,hse->hle', p.astype(bf16), v.astype(bf16),
                         preferred_element_type=f32)           # (H, L, E)
        ctx_acc[b] = jnp.swapaxes(ctx, 0, 1).reshape(L, D)     # merge heads
        return carry

    jax.lax.fori_loop(0, bt, attn_body, 0)

    # ---- output projection + residual + norm1 (slab-wise, lane-dense) ----
    attn_out = mm(ctx_acc[...].reshape(bt * L, D), wo) + bo
    h1 = _layer_norm(x_slab + attn_out, g1, be1)

    # ---- feed-forward: conv1d(k=1) -> relu -> conv1d(k=1) (slab-wise) ----
    y = jnp.maximum(mm(h1, w1) + b1, 0.0)
    y = mm(y, w2) + b2

    # ---- residual + norm2 ----
    out = _layer_norm(h1 + y, g2, be2)                         # (bt*L, D) f32
    x_acc[...] = out.reshape(bt, L, D)

    # ---- final Encoder norm + single whole-slab HBM write-back ----
    @pl.when(layer == n_layers - 1)
    def _():
        if apply_final_norm:
            fn = fn_ref[...]                                   # (2, D) f32
            final = _layer_norm(out, fn[0:1, :], fn[1:2, :])
        else:
            final = out
        o_ref[...] = final.reshape(bt, L, D).astype(o_ref.dtype)


# ----------------------------- wrapper ----------------------------------------

def encoder_forward(x, layer_params, final_norm, n_heads, *,
                    batch_tile=None, mxu_dtype=jnp.bfloat16,
                    weight_buffers=None):
    """Matches Encoder.forward (attn_mask=None): returns (x, attns)."""
    B, L, D = x.shape
    n_layers = len(layer_params)
    H = n_heads
    assert D % H == 0
    d_ff = layer_params[0]["w1"].shape[1]
    f32 = jnp.float32
    W = max(3 * D, d_ff)

    # ---- host-side parameter packing (free) ----
    # Fused QKV weight (D, 3D); big weights stacked along a layer axis (bf16).
    WQKV = jnp.stack([jnp.concatenate([p["wq"], p["wk"], p["wv"]], axis=1)
                      for p in layer_params]).astype(mxu_dtype)       # (nl, D, 3D)
    WO = jnp.stack([p["wo"] for p in layer_params]).astype(mxu_dtype)  # (nl, D, D)
    W1 = jnp.stack([p["w1"] for p in layer_params]).astype(mxu_dtype)  # (nl, D, F)
    W2 = jnp.stack([p["w2"] for p in layer_params]).astype(mxu_dtype)  # (nl, F, D)

    def _pad_row(v):
        v = jnp.reshape(v, (-1,)).astype(f32)
        return jnp.pad(v, (0, W - v.shape[0]))

    def _pack_small(p):
        rows = [
            jnp.concatenate([jnp.reshape(p["bq"], (-1,)),
                             jnp.reshape(p["bk"], (-1,)),
                             jnp.reshape(p["bv"], (-1,))]),     # fused QKV bias
            p["bo"], p["b1"], p["b2"],
            p["g1"], p["be1"], p["g2"], p["be2"],
        ]
        return jnp.stack([_pad_row(r) for r in rows])           # (8, W)

    SMALL = jnp.stack([_pack_small(p) for p in layer_params])   # (nl, 8, W) f32

    apply_final_norm = final_norm is not None
    if apply_final_norm:
        FN = jnp.stack([jnp.reshape(final_norm["gamma"], (-1,)),
                        jnp.reshape(final_norm["beta"], (-1,))]).astype(f32)
    else:
        FN = jnp.stack([jnp.ones((D,), f32), jnp.zeros((D,), f32)])  # unused

    # ---- per-generation VMEM budget & batch-tile selection ----
    try:
        phys_vmem = int(getattr(pltpu.get_tpu_info(), "vmem_capacity_bytes"))
    except Exception:
        phys_vmem = 128 * 1024 * 1024
    # ~96 MiB scoped on v5e/v6e (128 MiB physical), ~48 MiB on v7x (64 MiB).
    vmem_budget = min(int(phys_vmem * 0.75), 100 * 1024 * 1024)

    w_itemsize = jnp.dtype(mxu_dtype).itemsize
    act_itemsize = jnp.dtype(x.dtype).itemsize
    layer_w_bytes = (3 * D * D + D * D + 2 * D * d_ff) * w_itemsize + 8 * W * 4

    def _vmem_estimate(bt):
        rows = bt * L
        io = 2 * (2 * bt * L * D * act_itemsize)            # double-buffered in/out blocks
        scr = rows * (D + 3 * D + D) * 4                     # x_acc + qkv_acc + ctx_acc
        wts = 2 * layer_w_bytes                              # double-buffered weights
        tmp = (rows * (3 * D + d_ff) + 3 * H * L * L) * 4    # slab temps + per-seq scores
        return io + scr + wts + tmp

    if batch_tile is None:
        # Biggest batch tile that fits the budget: large bt*L raises arithmetic
        # intensity so the ~per-layer weight DMA (re-streamed once per batch
        # block) is hidden behind compute.  On v7x prefer B // bt >= 2 so both
        # TensorCores get a "parallel" batch block (pass batch_tile explicitly).
        bt = B
        while bt > 1 and _vmem_estimate(bt) > vmem_budget:
            nbt = bt - 1
            while nbt > 1 and B % nbt != 0:
                nbt -= 1
            bt = nbt
    else:
        bt = batch_tile
    assert B % bt == 0

    # ---- BlockSpecs ----
    def weight_spec(shape):
        # Optional deeper buffering of the big weight streams (v5e, if the
        # per-layer weight DMA is still exposed after growing bt).
        if weight_buffers is not None and weight_buffers > 2:
            return pl.BlockSpec(shape, lambda b, l: (l, 0, 0),
                                pipeline_mode=pl.Buffered(weight_buffers))
        return pl.BlockSpec(shape, lambda b, l: (l, 0, 0))

    in_specs = [
        pl.BlockSpec((bt, L, D), lambda b, l: (b, 0, 0)),        # x
        weight_spec((1, D, 3 * D)),                              # WQKV
        weight_spec((1, D, D)),                                  # WO
        weight_spec((1, D, d_ff)),                               # W1
        weight_spec((1, d_ff, D)),                               # W2
        pl.BlockSpec((1, 8, W), lambda b, l: (l, 0, 0)),         # SMALL (packed)
        pl.BlockSpec((2, D), lambda b, l: (0, 0)),               # final-norm params
    ]

    flops = 2 * B * L * n_layers * (4 * D * D + 2 * D * d_ff + 2 * L * D)
    transcendentals = n_layers * B * H * L * L
    # Weights are re-fetched once per batch block (layer axis is the inner axis).
    w_hbm_bytes = n_layers * layer_w_bytes * (B // bt)
    bytes_accessed = 2 * B * L * D * act_itemsize + w_hbm_bytes

    kernel = functools.partial(fused_encoder_kernel,
                               n_heads=H, seq_len=L, batch_tile=bt,
                               d_model=D, d_ff=d_ff,
                               apply_final_norm=apply_final_norm)

    out = pl.pallas_call(
        kernel,
        out_shape=jax.ShapeDtypeStruct((B, L, D), x.dtype),
        grid=(B // bt, n_layers),
        in_specs=in_specs,
        out_specs=pl.BlockSpec((bt, L, D), lambda b, l: (b, 0, 0)),
        scratch_shapes=[
            pltpu.VMEM((bt, L, D), jnp.float32),        # resident activations
            pltpu.VMEM((bt, L, 3 * D), jnp.float32),    # fused QKV
            pltpu.VMEM((bt, L, D), jnp.float32),        # merged attention context
        ],
        compiler_params=pltpu.CompilerParams(
            dimension_semantics=("parallel", "arbitrary"),
            vmem_limit_bytes=int(vmem_budget)),
        cost_estimate=pl.CostEstimate(flops=int(flops),
                                      transcendentals=int(transcendentals),
                                      bytes_accessed=int(bytes_accessed)),
    )(x, WQKV, WO, W1, W2, SMALL, FN)

    attns = [None] * n_layers   # FullAttention(output_attention=False) -> None
    return out, attns


# ------------------------- pure-JAX reference ---------------------------------

def _ref_layer(x, p, n_heads):
    B, L, D = x.shape
    E = D // n_heads
    q = x @ p["wq"] + p["bq"]
    k = x @ p["wk"] + p["bk"]
    v = x @ p["wv"] + p["bv"]
    q = q.reshape(B, L, n_heads, E)
    k = k.reshape(B, L, n_heads, E)
    v = v.reshape(B, L, n_heads, E)
    s = jnp.einsum("blhe,bshe->bhls", q, k) / math.sqrt(E)
    a = jax.nn.softmax(s, axis=-1)
    o = jnp.einsum("bhls,bshd->blhd", a, v).reshape(B, L, D)
    o = o @ p["wo"] + p["bo"]
    x = x + o
    mu = x.mean(-1, keepdims=True)
    x = (x - mu) / jnp.sqrt(((x - mu) ** 2).mean(-1, keepdims=True) + 1e-5)
    x = x * p["g1"] + p["be1"]
    y = jnp.maximum(x @ p["w1"] + p["b1"], 0.0) @ p["w2"] + p["b2"]
    z = x + y
    mu = z.mean(-1, keepdims=True)
    z = (z - mu) / jnp.sqrt(((z - mu) ** 2).mean(-1, keepdims=True) + 1e-5)
    return z * p["g2"] + p["be2"]


def _ref_encoder(x, layer_params, final_norm, n_heads):
    for p in layer_params:
        x = _ref_layer(x, p, n_heads)
    if final_norm is not None:
        mu = x.mean(-1, keepdims=True)
        x = (x - mu) / jnp.sqrt(((x - mu) ** 2).mean(-1, keepdims=True) + 1e-5)
        x = x * final_norm["gamma"] + final_norm["beta"]
    return x


# ----------------------------- main --------------------------------------------

if __name__ == "__main__":
    B, L, D, H, d_ff, n_layers = 2, 8, 32, 4, 64, 2
    key = jax.random.PRNGKey(0)

    def init_layer(k):
        ks = jax.random.split(k, 8)
        s = 0.05
        return {
            "wq": jax.random.normal(ks[0], (D, D), jnp.float32) * s,
            "bq": jnp.zeros((1, D), jnp.float32),
            "wk": jax.random.normal(ks[1], (D, D), jnp.float32) * s,
            "bk": jnp.zeros((1, D), jnp.float32),
            "wv": jax.random.normal(ks[2], (D, D), jnp.float32) * s,
            "bv": jnp.zeros((1, D), jnp.float32),
            "wo": jax.random.normal(ks[3], (D, D), jnp.float32) * s,
            "bo": jax.random.normal(ks[4], (1, D), jnp.float32) * s,
            "w1": jax.random.normal(ks[5], (D, d_ff), jnp.float32) * s,
            "b1": jnp.zeros((1, d_ff), jnp.float32),
            "w2": jax.random.normal(ks[6], (d_ff, D), jnp.float32) * s,
            "b2": jnp.zeros((1, D), jnp.float32),
            "g1": jnp.ones((1, D), jnp.float32),
            "be1": jnp.zeros((1, D), jnp.float32),
            "g2": jnp.ones((1, D), jnp.float32),
            "be2": jnp.zeros((1, D), jnp.float32),
        }

    keys = jax.random.split(key, n_layers + 1)
    layer_params = [init_layer(keys[i]) for i in range(n_layers)]
    final_norm = {"gamma": jnp.ones((1, D), jnp.float32),
                  "beta": jnp.zeros((1, D), jnp.float32)}

    x = jax.random.normal(keys[-1], (B, L, D), jnp.float32)

    out, attns = encoder_forward(x, layer_params, final_norm, n_heads=H)
    out = jax.block_until_ready(out)

    ref = _ref_encoder(x, layer_params, final_norm, H)
    # MXU operands are bf16 (f32 accumulation), hence the loosened tolerance;
    # the softmax reciprocal is now exact.
    np.testing.assert_allclose(np.asarray(out), np.asarray(ref),
                               rtol=3e-2, atol=3e-2)
    assert out.shape == (B, L, D) and len(attns) == n_layers

    print("KERNEL_OK")
</pallas_src>

<mosaic_0001>
module attributes {stable_mosaic.version = 11 : i64} {
  func.func @fused_encoder_kernel(%arg0: i32, %arg1: i32, %arg2: memref<2x8x32xf32, #tpu.memory_space<vmem>>, %arg3: memref<1x32x96xbf16, #tpu.memory_space<vmem>>, %arg4: memref<1x32x32xbf16, #tpu.memory_space<vmem>>, %arg5: memref<1x32x64xbf16, #tpu.memory_space<vmem>>, %arg6: memref<1x64x32xbf16, #tpu.memory_space<vmem>>, %arg7: memref<1x8x96xf32, #tpu.memory_space<vmem>>, %arg8: memref<2x32xf32, #tpu.memory_space<vmem>>, %arg9: memref<2x8x32xf32, #tpu.memory_space<vmem>>, %arg10: memref<2x8x32xf32, #tpu.memory_space<vmem>>, %arg11: memref<2x8x96xf32, #tpu.memory_space<vmem>>, %arg12: memref<2x8x32xf32, #tpu.memory_space<vmem>>) attributes {dimension_semantics = [#tpu.dimension_semantics<parallel>, #tpu.dimension_semantics<arbitrary>], iteration_bounds = array<i64: 1, 2>, scalar_prefetch = 0 : i64, scratch_operands = 3 : i64, tpu.core_type = #tpu.core_type<tc>, window_params = [{transform_indices = @transform_0, window_bounds = array<i64: 2, 8, 32>}, {transform_indices = @transform_1, window_bounds = array<i64: 1, 32, 96>}, {transform_indices = @transform_2, window_bounds = array<i64: 1, 32, 32>}, {transform_indices = @transform_3, window_bounds = array<i64: 1, 32, 64>}, {transform_indices = @transform_4, window_bounds = array<i64: 1, 64, 32>}, {transform_indices = @transform_5, window_bounds = array<i64: 1, 8, 96>}, {pipeline_mode = #tpu.pipeline_mode<synchronous>, transform_indices = @transform_6, window_bounds = array<i64: 2, 32>}, {transform_indices = @transform_7, window_bounds = array<i64: 2, 8, 32>}]} {
    %c0_i32 = arith.constant 0 : i32
    %0 = arith.cmpi eq, %arg1, %c0_i32 : i32
    %1 = arith.extui %0 : i1 to i32
    %c0_i32_0 = arith.constant 0 : i32
    %2 = arith.cmpi ne, %1, %c0_i32_0 : i32
    scf.if %2 {
      %c0_45 = arith.constant 0 : index
      %c0_46 = arith.constant 0 : index
      %c0_47 = arith.constant 0 : index
      %93 = vector.load %arg2[%c0_45, %c0_46, %c0_47] : memref<2x8x32xf32, #tpu.memory_space<vmem>>, vector<2x8x32xf32>
      %c0_48 = arith.constant 0 : index
      %c0_49 = arith.constant 0 : index
      %c0_50 = arith.constant 0 : index
      %94 = vector.load %arg10[%c0_48, %c0_49, %c0_50] : memref<2x8x32xf32, #tpu.memory_space<vmem>>, vector<2x8x32xf32>
      tpu.vector_store %arg10[%c0_48, %c0_49, %c0_50], %93 {strides = array<i32>} : memref<2x8x32xf32, #tpu.memory_space<vmem>>, vector<2x8x32xf32>,
    } else {
    }
    %c0 = arith.constant 0 : index
    %c0_1 = arith.constant 0 : index
    %c0_2 = arith.constant 0 : index
    %3 = vector.load %arg3[%c0, %c0_1, %c0_2] : memref<1x32x96xbf16, #tpu.memory_space<vmem>>, vector<1x32x96xbf16>
    %4 = vector.shape_cast %3 : vector<1x32x96xbf16> to vector<32x96xbf16>
    %c0_3 = arith.constant 0 : index
    %c0_4 = arith.constant 0 : index
    %c0_5 = arith.constant 0 : index
    %5 = vector.load %arg4[%c0_3, %c0_4, %c0_5] : memref<1x32x32xbf16, #tpu.memory_space<vmem>>, vector<1x32x32xbf16>
    %6 = vector.shape_cast %5 : vector<1x32x32xbf16> to vector<32x32xbf16>
    %c0_6 = arith.constant 0 : index
    %c0_7 = arith.constant 0 : index
    %c0_8 = arith.constant 0 : index
    %7 = vector.load %arg5[%c0_6, %c0_7, %c0_8] : memref<1x32x64xbf16, #tpu.memory_space<vmem>>, vector<1x32x64xbf16>
    %8 = vector.shape_cast %7 : vector<1x32x64xbf16> to vector<32x64xbf16>
    %c0_9 = arith.constant 0 : index
    %c0_10 = arith.constant 0 : index
    %c0_11 = arith.constant 0 : index
    %9 = vector.load %arg6[%c0_9, %c0_10, %c0_11] : memref<1x64x32xbf16, #tpu.memory_space<vmem>>, vector<1x64x32xbf16>
    %10 = vector.shape_cast %9 : vector<1x64x32xbf16> to vector<64x32xbf16>
    %c0_12 = arith.constant 0 : index
    %c0_13 = arith.constant 0 : index
    %c0_14 = arith.constant 0 : index
    %11 = vector.load %arg7[%c0_12, %c0_13, %c0_14] : memref<1x8x96xf32, #tpu.memory_space<vmem>>, vector<1x8x96xf32>
    %12 = vector.shape_cast %11 : vector<1x8x96xf32> to vector<8x96xf32>
    %13 = vector.extract_strided_slice %12 {offsets = [0, 0], sizes = [1, 96], strides = [1, 1]} : vector<8x96xf32> to vector<1x96xf32>
    %14 = vector.extract_strided_slice %12 {offsets = [1, 0], sizes = [1, 32], strides = [1, 1]} : vector<8x96xf32> to vector<1x32xf32>
    %15 = vector.extract_strided_slice %12 {offsets = [2, 0], sizes = [1, 64], strides = [1, 1]} : vector<8x96xf32> to vector<1x64xf32>
    %16 = vector.extract_strided_slice %12 {offsets = [3, 0], sizes = [1, 32], strides = [1, 1]} : vector<8x96xf32> to vector<1x32xf32>
    %17 = vector.extract_strided_slice %12 {offsets = [4, 0], sizes = [1, 32], strides = [1, 1]} : vector<8x96xf32> to vector<1x32xf32>
    %18 = vector.extract_strided_slice %12 {offsets = [5, 0], sizes = [1, 32], strides = [1, 1]} : vector<8x96xf32> to vector<1x32xf32>
    %19 = vector.extract_strided_slice %12 {offsets = [6, 0], sizes = [1, 32], strides = [1, 1]} : vector<8x96xf32> to vector<1x32xf32>
    %20 = vector.extract_strided_slice %12 {offsets = [7, 0], sizes = [1, 32], strides = [1, 1]} : vector<8x96xf32> to vector<1x32xf32>
    %c0_15 = arith.constant 0 : index
    %c0_16 = arith.constant 0 : index
    %c0_17 = arith.constant 0 : index
    %21 = vector.load %arg10[%c0_15, %c0_16, %c0_17] : memref<2x8x32xf32, #tpu.memory_space<vmem>>, vector<2x8x32xf32>
    %22 = vector.shape_cast %21 : vector<2x8x32xf32> to vector<16x32xf32>
    %23 = arith.truncf %22 : vector<16x32xf32> to vector<16x32xbf16>
    %cst = arith.constant dense<0.000000e+00> : vector<16x96xf32>
    %24 = tpu.matmul %23, %4, %cst {dimension_numbers = #tpu.dot_dimension_numbers<[1], [0], [0], [1], [0, 0, 1, 1], [], []>} : vector<16x32xbf16>, vector<32x96xbf16>, vector<16x96xf32> -> vector<16x96xf32>
    %25 = vector.broadcast %13 : vector<1x96xf32> to vector<16x96xf32>
    %26 = arith.addf %24, %25 : vector<16x96xf32>
    %27 = vector.shape_cast %26 : vector<16x96xf32> to vector<2x8x96xf32>
    %c0_18 = arith.constant 0 : index
    %c0_19 = arith.constant 0 : index
    %c0_20 = arith.constant 0 : index
    %28 = vector.load %arg11[%c0_18, %c0_19, %c0_20] : memref<2x8x96xf32, #tpu.memory_space<vmem>>, vector<2x8x96xf32>
    tpu.vector_store %arg11[%c0_18, %c0_19, %c0_20], %27 {strides = array<i32>} : memref<2x8x96xf32, #tpu.memory_space<vmem>>, vector<2x8x96xf32>,
    %c0_i32_21 = arith.constant 0 : i32
    %c2_i32 = arith.constant 2 : i32
    %29 = arith.addi %c0_i32_21, %c2_i32 : i32
    %c1_i32 = arith.constant 1 : i32
    scf.for %arg13 = %c0_i32_21 to %29 step %c1_i32  : i32 {
      %93 = arith.index_cast %arg13 : i32 to index
      %c0_45 = arith.constant 0 : index
      %c0_46 = arith.constant 0 : index
      %94 = vector.load %arg11[%93, %c0_45, %c0_46] : memref<2x8x96xf32, #tpu.memory_space<vmem>>, vector<1x8x96xf32>
      %95 = vector.shape_cast %94 : vector<1x8x96xf32> to vector<8x96xf32>
      %96 = vector.extract_strided_slice %95 {offsets = [0, 0], sizes = [8, 32], strides = [1, 1]} : vector<8x96xf32> to vector<8x32xf32>
      %97 = vector.shape_cast %96 : vector<8x32xf32> to vector<8x4x8xf32>
      %98 = tpu.transpose %97, [1, 0, 2] : vector<8x4x8xf32> -> vector<4x8x8xf32>
      %99 = vector.extract_strided_slice %95 {offsets = [0, 32], sizes = [8, 32], strides = [1, 1]} : vector<8x96xf32> to vector<8x32xf32>
      %100 = vector.shape_cast %99 : vector<8x32xf32> to vector<8x4x8xf32>
      %101 = tpu.transpose %100, [1, 0, 2] : vector<8x4x8xf32> -> vector<4x8x8xf32>
      %102 = vector.extract_strided_slice %95 {offsets = [0, 64], sizes = [8, 32], strides = [1, 1]} : vector<8x96xf32> to vector<8x32xf32>
      %103 = vector.shape_cast %102 : vector<8x32xf32> to vector<8x4x8xf32>
      %104 = tpu.transpose %103, [1, 0, 2] : vector<8x4x8xf32> -> vector<4x8x8xf32>
      %105 = arith.truncf %98 : vector<4x8x8xf32> to vector<4x8x8xbf16>
      %106 = arith.truncf %101 : vector<4x8x8xf32> to vector<4x8x8xbf16>
      "tpu.trace_start"() <{level = 10 : i32, message = "hle,hse->hls"}> : () -> ()
      %cst_47 = arith.constant dense<0.000000e+00> : vector<4x8x8xf32>
      %107 = tpu.matmul %105, %106, %cst_47 {dimension_numbers = #tpu.dot_dimension_numbers<[2], [2], [1], [1], [0, 0, 0, 1, 1, 1], [0], [0]>} : vector<4x8x8xbf16>, vector<4x8x8xbf16>, vector<4x8x8xf32> -> vector<4x8x8xf32>
      "tpu.trace_stop"() : () -> ()
      %cst_48 = arith.constant 0.353553385 : f32
      %108 = vector.broadcast %cst_48 : f32 to vector<4x8x8xf32>
      %109 = arith.mulf %107, %108 : vector<4x8x8xf32>
      %cst_49 = arith.constant dense<0xFF800000> : vector<4x8xf32>
      %110 = vector.multi_reduction <maximumf>, %109, %cst_49 [2] : vector<4x8x8xf32> to vector<4x8xf32>
      %111 = vector.shape_cast %110 : vector<4x8xf32> to vector<4x8x1xf32>
      %112 = vector.broadcast %111 : vector<4x8x1xf32> to vector<4x8x8xf32>
      %113 = arith.subf %109, %112 : vector<4x8x8xf32>
      %114 = math.exp %113 : vector<4x8x8xf32>
      %cst_50 = arith.constant dense<0.000000e+00> : vector<4x8xf32>
      %115 = vector.multi_reduction <add>, %114, %cst_50 [2] : vector<4x8x8xf32> to vector<4x8xf32>
      %116 = vector.shape_cast %115 : vector<4x8xf32> to vector<4x8x1xf32>
      %117 = tpu.reciprocal %116 : vector<4x8x1xf32> -> vector<4x8x1xf32>
      %118 = vector.broadcast %117 : vector<4x8x1xf32> to vector<4x8x8xf32>
      %119 = arith.mulf %114, %118 : vector<4x8x8xf32>
      %120 = arith.truncf %119 : vector<4x8x8xf32> to vector<4x8x8xbf16>
      %121 = arith.truncf %104 : vector<4x8x8xf32> to vector<4x8x8xbf16>
      "tpu.trace_start"() <{level = 10 : i32, message = "hls,hse->hle"}> : () -> ()
      %cst_51 = arith.constant dense<0.000000e+00> : vector<4x8x8xf32>
      %122 = tpu.matmul %120, %121, %cst_51 {dimension_numbers = #tpu.dot_dimension_numbers<[2], [1], [1], [2], [0, 0, 0, 1, 1, 2], [0], [0]>} : vector<4x8x8xbf16>, vector<4x8x8xbf16>, vector<4x8x8xf32> -> vector<4x8x8xf32>
      "tpu.trace_stop"() : () -> ()
      %123 = tpu.transpose %122, [1, 0, 2] : vector<4x8x8xf32> -> vector<8x4x8xf32>
      %124 = vector.shape_cast %123 : vector<8x4x8xf32> to vector<8x32xf32>
      %125 = arith.index_cast %arg13 : i32 to index
      %c0_52 = arith.constant 0 : index
      %c0_53 = arith.constant 0 : index
      %126 = vector.load %arg12[%125, %c0_52, %c0_53] : memref<2x8x32xf32, #tpu.memory_space<vmem>>, vector<1x8x32xf32>
      %127 = vector.shape_cast %126 : vector<1x8x32xf32> to vector<8x32xf32>
      %128 = vector.shape_cast %124 : vector<8x32xf32> to vector<1x8x32xf32>
      tpu.vector_store %arg12[%125, %c0_52, %c0_53], %128 {strides = array<i32>} : memref<2x8x32xf32, #tpu.memory_space<vmem>>, vector<1x8x32xf32>,
    }
    %c2_i32_22 = arith.constant 2 : i32
    %c0_23 = arith.constant 0 : index
    %c0_24 = arith.constant 0 : index
    %c0_25 = arith.constant 0 : index
    %30 = vector.load %arg12[%c0_23, %c0_24, %c0_25] : memref<2x8x32xf32, #tpu.memory_space<vmem>>, vector<2x8x32xf32>
    %31 = vector.shape_cast %30 : vector<2x8x32xf32> to vector<16x32xf32>
    %32 = arith.truncf %31 : vector<16x32xf32> to vector<16x32xbf16>
    %cst_26 = arith.constant dense<0.000000e+00> : vector<16x32xf32>
    %33 = tpu.matmul %32, %6, %cst_26 {dimension_numbers = #tpu.dot_dimension_numbers<[1], [0], [0], [1], [0, 0, 1, 1], [], []>} : vector<16x32xbf16>, vector<32x32xbf16>, vector<16x32xf32> -> vector<16x32xf32>
    %34 = vector.broadcast %14 : vector<1x32xf32> to vector<16x32xf32>
    %35 = arith.addf %33, %34 : vector<16x32xf32>
    %36 = arith.addf %22, %35 : vector<16x32xf32>
    %cst_27 = arith.constant dense<0.000000e+00> : vector<16xf32>
    %37 = vector.multi_reduction <add>, %36, %cst_27 [1] : vector<16x32xf32> to vector<16xf32>
    %38 = vector.shape_cast %37 : vector<16xf32> to vector<16x1xf32>
    %cst_28 = arith.constant 3.200000e+01 : f32
    %39 = vector.broadcast %cst_28 : f32 to vector<16x1xf32>
    %40 = arith.divf %38, %39 : vector<16x1xf32>
    %41 = vector.broadcast %40 : vector<16x1xf32> to vector<16x32xf32>
    %42 = arith.subf %36, %41 : vector<16x32xf32>
    %43 = arith.mulf %42, %42 : vector<16x32xf32>
    %cst_29 = arith.constant dense<0.000000e+00> : vector<16xf32>
    %44 = vector.multi_reduction <add>, %43, %cst_29 [1] : vector<16x32xf32> to vector<16xf32>
    %45 = vector.shape_cast %44 : vector<16xf32> to vector<16x1xf32>
    %cst_30 = arith.constant 3.200000e+01 : f32
    %46 = vector.broadcast %cst_30 : f32 to vector<16x1xf32>
    %47 = arith.divf %45, %46 : vector<16x1xf32>
    %cst_31 = arith.constant 9.99999974E-6 : f32
    %48 = vector.broadcast %cst_31 : f32 to vector<16x1xf32>
    %49 = arith.addf %47, %48 : vector<16x1xf32>
    %50 = math.rsqrt %49 : vector<16x1xf32>
    %51 = vector.broadcast %50 : vector<16x1xf32> to vector<16x32xf32>
    %52 = arith.mulf %42, %51 : vector<16x32xf32>
    %53 = vector.broadcast %17 : vector<1x32xf32> to vector<16x32xf32>
    %54 = arith.mulf %52, %53 : vector<16x32xf32>
    %55 = vector.broadcast %18 : vector<1x32xf32> to vector<16x32xf32>
    %56 = arith.addf %54, %55 : vector<16x32xf32>
    %57 = arith.truncf %56 : vector<16x32xf32> to vector<16x32xbf16>
    %cst_32 = arith.constant dense<0.000000e+00> : vector<16x64xf32>
    %58 = tpu.matmul %57, %8, %cst_32 {dimension_numbers = #tpu.dot_dimension_numbers<[1], [0], [0], [1], [0, 0, 1, 1], [], []>} : vector<16x32xbf16>, vector<32x64xbf16>, vector<16x64xf32> -> vector<16x64xf32>
    %59 = vector.broadcast %15 : vector<1x64xf32> to vector<16x64xf32>
    %60 = arith.addf %58, %59 : vector<16x64xf32>
    %cst_33 = arith.constant 0.000000e+00 : f32
    %61 = vector.broadcast %cst_33 : f32 to vector<16x64xf32>
    %62 = arith.maximumf %60, %61 : vector<16x64xf32>
    %63 = arith.truncf %62 : vector<16x64xf32> to vector<16x64xbf16>
    %cst_34 = arith.constant dense<0.000000e+00> : vector<16x32xf32>
    %64 = tpu.matmul %63, %10, %cst_34 {dimension_numbers = #tpu.dot_dimension_numbers<[1], [0], [0], [1], [0, 0, 1, 1], [], []>} : vector<16x64xbf16>, vector<64x32xbf16>, vector<16x32xf32> -> vector<16x32xf32>
    %65 = vector.broadcast %16 : vector<1x32xf32> to vector<16x32xf32>
    %66 = arith.addf %64, %65 : vector<16x32xf32>
    %67 = arith.addf %56, %66 : vector<16x32xf32>
    %cst_35 = arith.constant dense<0.000000e+00> : vector<16xf32>
    %68 = vector.multi_reduction <add>, %67, %cst_35 [1] : vector<16x32xf32> to vector<16xf32>
    %69 = vector.shape_cast %68 : vector<16xf32> to vector<16x1xf32>
    %cst_36 = arith.constant 3.200000e+01 : f32
    %70 = vector.broadcast %cst_36 : f32 to vector<16x1xf32>
    %71 = arith.divf %69, %70 : vector<16x1xf32>
    %72 = vector.broadcast %71 : vector<16x1xf32> to vector<16x32xf32>
    %73 = arith.subf %67, %72 : vector<16x32xf32>
    %74 = arith.mulf %73, %73 : vector<16x32xf32>
    %cst_37 = arith.constant dense<0.000000e+00> : vector<16xf32>
    %75 = vector.multi_reduction <add>, %74, %cst_37 [1] : vector<16x32xf32> to vector<16xf32>
    %76 = vector.shape_cast %75 : vector<16xf32> to vector<16x1xf32>
    %cst_38 = arith.constant 3.200000e+01 : f32
    %77 = vector.broadcast %cst_38 : f32 to vector<16x1xf32>
    %78 = arith.divf %76, %77 : vector<16x1xf32>
    %cst_39 = arith.constant 9.99999974E-6 : f32
    %79 = vector.broadcast %cst_39 : f32 to vector<16x1xf32>
    %80 = arith.addf %78, %79 : vector<16x1xf32>
    %81 = math.rsqrt %80 : vector<16x1xf32>
    %82 = vector.broadcast %81 : vector<16x1xf32> to vector<16x32xf32>
    %83 = arith.mulf %73, %82 : vector<16x32xf32>
    %84 = vector.broadcast %19 : vector<1x32xf32> to vector<16x32xf32>
    %85 = arith.mulf %83, %84 : vector<16x32xf32>
    %86 = vector.broadcast %20 : vector<1x32xf32> to vector<16x32xf32>
    %87 = arith.addf %85, %86 : vector<16x32xf32>
    %88 = vector.shape_cast %87 : vector<16x32xf32> to vector<2x8x32xf32>
    %c0_40 = arith.constant 0 : index
    %c0_41 = arith.constant 0 : index
    %c0_42 = arith.constant 0 : index
    %89 = vector.load %arg10[%c0_40, %c0_41, %c0_42] : memref<2x8x32xf32, #tpu.memory_space<vmem>>, vector<2x8x32xf32>
    tpu.vector_store %arg10[%c0_40, %c0_41, %c0_42], %88 {strides = array<i32>} : memref<2x8x32xf32, #tpu.memory_space<vmem>>, vector<2x8x32xf32>,
    %c1_i32_43 = arith.constant 1 : i32
    %90 = arith.cmpi eq, %arg1, %c1_i32_43 : i32
    %91 = arith.extui %90 : i1 to i32
    %c0_i32_44 = arith.constant 0 : i32
    %92 = arith.cmpi ne, %91, %c0_i32_44 : i32
    scf.if %92 {
      %c0_45 = arith.constant 0 : index
      %c0_46 = arith.constant 0 : index
      %93 = vector.load %arg8[%c0_45, %c0_46] : memref<2x32xf32, #tpu.memory_space<vmem>>, vector<2x32xf32>
      %94 = vector.extract_strided_slice %93 {offsets = [0, 0], sizes = [1, 32], strides = [1, 1]} : vector<2x32xf32> to vector<1x32xf32>
      %95 = vector.extract_strided_slice %93 {offsets = [1, 0], sizes = [1, 32], strides = [1, 1]} : vector<2x32xf32> to vector<1x32xf32>
      %cst_47 = arith.constant dense<0.000000e+00> : vector<16xf32>
      %96 = vector.multi_reduction <add>, %87, %cst_47 [1] : vector<16x32xf32> to vector<16xf32>
      %97 = vector.shape_cast %96 : vector<16xf32> to vector<16x1xf32>
      %cst_48 = arith.constant 3.200000e+01 : f32
      %98 = vector.broadcast %cst_48 : f32 to vector<16x1xf32>
      %99 = arith.divf %97, %98 : vector<16x1xf32>
      %100 = vector.broadcast %99 : vector<16x1xf32> to vector<16x32xf32>
      %101 = arith.subf %87, %100 : vector<16x32xf32>
      %102 = arith.mulf %101, %101 : vector<16x32xf32>
      %cst_49 = arith.constant dense<0.000000e+00> : vector<16xf32>
      %103 = vector.multi_reduction <add>, %102, %cst_49 [1] : vector<16x32xf32> to vector<16xf32>
      %104 = vector.shape_cast %103 : vector<16xf32> to vector<16x1xf32>
      %cst_50 = arith.constant 3.200000e+01 : f32
      %105 = vector.broadcast %cst_50 : f32 to vector<16x1xf32>
      %106 = arith.divf %104, %105 : vector<16x1xf32>
      %cst_51 = arith.constant 9.99999974E-6 : f32
      %107 = vector.broadcast %cst_51 : f32 to vector<16x1xf32>
      %108 = arith.addf %106, %107 : vector<16x1xf32>
      %109 = math.rsqrt %108 : vector<16x1xf32>
      %110 = vector.broadcast %109 : vector<16x1xf32> to vector<16x32xf32>
      %111 = arith.mulf %101, %110 : vector<16x32xf32>
      %112 = vector.broadcast %94 : vector<1x32xf32> to vector<16x32xf32>
      %113 = arith.mulf %111, %112 : vector<16x32xf32>
      %114 = vector.broadcast %95 : vector<1x32xf32> to vector<16x32xf32>
      %115 = arith.addf %113, %114 : vector<16x32xf32>
      %116 = vector.shape_cast %115 : vector<16x32xf32> to vector<2x8x32xf32>
      %c0_52 = arith.constant 0 : index
      %c0_53 = arith.constant 0 : index
      %c0_54 = arith.constant 0 : index
      %117 = vector.load %arg9[%c0_52, %c0_53, %c0_54] : memref<2x8x32xf32, #tpu.memory_space<vmem>>, vector<2x8x32xf32>
      tpu.vector_store %arg9[%c0_52, %c0_53, %c0_54], %116 {strides = array<i32>} : memref<2x8x32xf32, #tpu.memory_space<vmem>>, vector<2x8x32xf32>,
    } else {
    }
    return
  }
  func.func @transform_0(%arg0: i32, %arg1: i32) -> (i32, i32, i32) {
    %c0_i32 = arith.constant 0 : i32
    %c0_i32_0 = arith.constant 0 : i32
    %c0_i32_1 = arith.constant 0 : i32
    return %arg0, %c0_i32, %c0_i32_0 : i32, i32, i32
  }
  func.func @transform_1(%arg0: i32, %arg1: i32) -> (i32, i32, i32) {
    %c0_i32 = arith.constant 0 : i32
    %c0_i32_0 = arith.constant 0 : i32
    %c0_i32_1 = arith.constant 0 : i32
    return %arg1, %c0_i32, %c0_i32_0 : i32, i32, i32
  }
  func.func @transform_2(%arg0: i32, %arg1: i32) -> (i32, i32, i32) {
    %c0_i32 = arith.constant 0 : i32
    %c0_i32_0 = arith.constant 0 : i32
    %c0_i32_1 = arith.constant 0 : i32
    return %arg1, %c0_i32, %c0_i32_0 : i32, i32, i32
  }
  func.func @transform_3(%arg0: i32, %arg1: i32) -> (i32, i32, i32) {
    %c0_i32 = arith.constant 0 : i32
    %c0_i32_0 = arith.constant 0 : i32
    %c0_i32_1 = arith.constant 0 : i32
    return %arg1, %c0_i32, %c0_i32_0 : i32, i32, i32
  }
  func.func @transform_4(%arg0: i32, %arg1: i32) -> (i32, i32, i32) {
    %c0_i32 = arith.constant 0 : i32
    %c0_i32_0 = arith.constant 0 : i32
    %c0_i32_1 = arith.constant 0 : i32
    return %arg1, %c0_i32, %c0_i32_0 : i32, i32, i32
  }
  func.func @transform_5(%arg0: i32, %arg1: i32) -> (i32, i32, i32) {
    %c0_i32 = arith.constant 0 : i32
    %c0_i32_0 = arith.constant 0 : i32
    %c0_i32_1 = arith.constant 0 : i32
    return %arg1, %c0_i32, %c0_i32_0 : i32, i32, i32
  }
  func.func @transform_6(%arg0: i32, %arg1: i32) -> (i32, i32) {
    %c0_i32 = arith.constant 0 : i32
    %c0_i32_0 = arith.constant 0 : i32
    %c0_i32_1 = arith.constant 0 : i32
    return %c0_i32, %c0_i32_0 : i32, i32
  }
  func.func @transform_7(%arg0: i32, %arg1: i32) -> (i32, i32, i32) {
    %c0_i32 = arith.constant 0 : i32
    %c0_i32_0 = arith.constant 0 : i32
    %c0_i32_1 = arith.constant 0 : i32
    return %arg0, %c0_i32, %c0_i32_0 : i32, i32, i32
  }
}

</mosaic_0001>

<bundles_post_ra>
// kernel: tpu_custom_call.1
= control target key start
LH: loop header
LB: loop body
LE: loop exit
PB: predicated region body
PF: predicated region fallthrough
CT: control target
= control target key end

     0   :  { %12 = vsyncpa [#allocation6], 0  ;;  %s2982_s0 = inlined_call_operand.hbm [shape: f32[2,8,32], index: 0, kind: input, shape index: {}]   ;;  %s2983_s1 = inlined_call_operand.vmem [shape: bf16[2,32,96], index: 1, kind: input, shape index: {}]   ;;  %s2984_s2 = inlined_call_operand.vmem [shape: bf16[2,32,32], index: 2, kind: input, shape index: {}]   ;;  %s2985_s3 = inlined_call_operand.vmem [shape: bf16[2,32,64], index: 3, kind: input, shape index: {}]   ;;  %s2986_s4 = inlined_call_operand.vmem [shape: bf16[2,64,32], index: 4, kind: input, shape index: {}]   ;;  %s2987_s5 = inlined_call_operand.hbm [shape: f32[2,8,96], index: 5, kind: input, shape index: {}]   ;;  %s2988_s6 = inlined_call_operand.vmem [shape: f32[2,32], index: 6, kind: input, shape index: {}]   ;;  %s2989_s7 = inlined_call_operand.hbm [shape: f32[2,8,32], index: 7, kind: output, shape index: {}]  }
   0x1   :  { %13 = vsyncpa [#allocation9], 0 }
   0x2   :  { %15 = vsyncpa [#allocation9 + $0x1], 0 }
   0x3   :  { %16 = vsyncpa [#allocation7], 0  ;;  %s2522_s24 = smov 0   ;;  %s2524_s25 = smov 0  }
   0x4   :  { %s2526_s26 = smov 0   ;;  %s2528_s27 = smov 0  }
   0x5   :  { %s2530_s28 = smov 0   ;;  %s2532_s29 = smov 0  }
   0x6 LB: > { %s2990_s30 = sadd.s32 4294967295, %s2455_s29   ;;  %p184_p0 = scmp.ne.s32.totalorder %s2439_s25, %s2435_s24  ;;  %s2455_s29 = sphi %s2532_s29, %s22_s29   ;;  %s2451_s28 = sphi %s2530_s28, %s3003_s28   ;;  %s2447_s27 = sphi %s2528_s27, %s3002_s27   ;;  %s2443_s26 = sphi %s2526_s26, %s3001_s26   ;;  %s2439_s25 = sphi %s2524_s25, %s3000_s25   ;;  %s2435_s24 = sphi %s2522_s24, %s2999_s24  }
   0x7   : > { %p2554_p1 = scmp.eq.s32.totalorder %s2990_s30, 0  ;;  %p2015_p2 = scmp.ge.s32.totalorder %s2455_s29, 1 }
   0x8   : > { %p242_p3 = scmp.lt.s32.totalorder %s2455_s29, 3  ;;  %s2461_s11 = smov [#allocation5]  }
   0x9   : > { %p2562_p4 = por %p2554_p1, %p184_p0  ;;  %s257_s12 = sshll.u32 %s2461_s11, 4  ;;  %s258_s12 = int_to_ptr.vmem [resolvable:$true] %s257_s12 }
   0xa   : > { %p2566_p5 = pnand %p2015_p2, %p242_p3  ;;  %s31_s14 = sadd.s32 1, %s2451_s28 }
   0xb   : > { %s2326_s15 = scalar_lea.vmem %s258_s12, 256  ;;  %p2334_p12 = scmp.lt.s32.totalorder %s258_s12, %s258_s12 }
   0xc   : > { %p2196_p6 = pneg %p2566_p5  ;;  %p2327_p9 = scmp.ne.s32.totalorder %s258_s12, %s2326_s15 }
   0xd   : > { %p2335_p13 = scmp.lt.s32.totalorder %s2326_s15, %s2326_s15 }
   0xe   : > { %p2574_p7 = pnand %p2196_p6, %p2554_p1 }
   0xf   : > { %p2336_p0 = por %p2335_p13, %p2334_p12 }
  0x10   : > { %p2317_p8 = pneg %p2574_p7 }
  0x12   : > { %p2329_p10 = pnand %p2327_p9, %p2317_p8 }
  0x14   : > { %p2330_p11 = pneg %p2329_p10 }
  0x16   : > { %p2337_p2 = pnand %p2336_p0, %p2330_p11 }
  0x18   : > { %2340 = shalt.err (!%p2337_p2)
}
  0x19   : > { %s2462_s16 = smov 128   ;;  %s2463_s17 = smov 8  }
  0x1a   : > { %2199 = dma.hbm_to_vmem [thread:$0]  (!%p2574_p7), %s2982_s0, 256, %s258_s12, [#allocation6], %s2462_s16, %s2462_s16, %s2463_s17  }
  0x1b   : > { %p32_p3 = scmp.ge.s32.totalorder %s31_s14, 2  ;;  %s171_s20 = sadd.s32 1, %s2443_s26 }
  0x1c   : > { %p178_p6 = scmp.ne.s32.totalorder %s2443_s26, %s2439_s25  ;;  %p179_p8 = scmp.eq.s32.totalorder %s2455_s29, 0 }
  0x1d   : > { %s3005_s14 = smov (%p32_p3, %s31_s14), 0  ;;  %p2205_p10 = scmp.lt.s32.totalorder %s2455_s29, 2 }
  0x1e   : > { %p180_p9 = por %p179_p8, %p178_p6  ;;  %s168_s21 = ssub.s32 %s2451_s28, %s3005_s14 }
  0x1f   : > { %s306_s22 = sand.u32 1, %s2443_s26   ;;  %p169_p11 = scmp.eq.s32.totalorder %s168_s21, 0 }
  0x20   : > { %s2018_s23 = sshll.u32 %s306_s22, 3  ;;  %s2019_s24 = sshll.u32 %s2451_s28, 7 }
  0x21   : > { %s2598_s11 = scalar_select %p169_p11, %s2443_s26, %s171_s20  }
  0x22   : > { %s315_s12 = scalar_lea.hbm %s2987_s5, %s2019_s24  ;;  %s310_s16 = scalar_lea.vmem [#allocation8], %s2018_s23 }
  0x23   : > { %s317_s17 = sshll.u32 %s310_s16, 4  ;;  %p2603_p7 = pnand %p2205_p10, %p180_p9  ;;  %s318_s17 = int_to_ptr.vmem [resolvable:$true] %s317_s17 }
  0x24   : > { %s307_s19 = scalar_lea.sflag [#allocation9], %s306_s22  ;;  %s2354_s21 = scalar_lea.vmem %s318_s17, 128 }
  0x25   : > { %p2343_p12 = pneg %p2603_p7  ;;  %p2355_p13 = scmp.ne.s32.totalorder %s318_s17, %s2354_s21 }
  0x26   : > { %s2464_s20 = smov [#allocation8]  }
  0x27   : > { %p2357_p0 = pnand %p2355_p13, %p2343_p12  ;;  %s2359_s30 = sshll.u32 %s2464_s20, 4  ;;  %s2360_s30 = int_to_ptr.vmem [resolvable:$false] %s2359_s30 }
  0x28   : > { %s2361_s13 = scalar_lea.vmem %s2360_s30, 256  ;;  %p2362_p3 = scmp.lt.s32.totalorder %s318_s17, %s2360_s30 }
  0x29   : > { %p2358_p2 = pneg %p2357_p0  ;;  %p2363_p6 = scmp.lt.s32.totalorder %s2361_s13, %s2354_s21 }
  0x2b   : > { %p2364_p8 = por %p2363_p6, %p2362_p3 }
  0x2d   : > { %p2365_p9 = pnand %p2364_p8, %p2358_p2 }
  0x2f   : > { %2368 = shalt.err (!%p2365_p9)
}
  0x30   : > { %2203 = dma.hbm_to_vmem [thread:$0]  (!%p2603_p7), %s315_s12, 128, %s318_s17, %s307_s19  }
  0x31   : > { %326 = sbr.rel (%p2566_p5) target bundleno = 3008 (0xbc0), region = 48 }
  0x36   : > { %2422 = dma.done.wait (%p2554_p1), [#allocation6], 256  }
  0x37   : > { %2424 = vsyncadd (%p2554_p1), [#allocation6], 4294967040  ;;  %s332_s22 = sand.u32 1, %s2439_s25  }
  0x38   : > { %s2618_s30 = sshll.u32 %s332_s22, 3  ;;  %s333_s23 = scalar_lea.sflag [#allocation9], %s332_s22 }
  0x39   : > { %2426 = dma.done.wait (%p2562_p4), %s333_s23, 128  }
  0x3a   : > { %2428 = vsyncadd (%p2562_p4), %s333_s23, 4294967168  ;;  %p383_p5 = scmp.lt.s32.totalorder %s2447_s27, 1  ;;  %p2031_p1 = scmp.ne.s32.totalorder %s2447_s27, 0 }
  0x3c   : > { %s384_s10 = scalar_select %p383_p5, %s2447_s27, 1 }
  0x3d   : > { %408 = sbr.rel (%p2031_p1) target bundleno = 68 (0x44), region = 60 }
  0x3e   : > { %s2068_s15 = sshll.u32 %s384_s10, 4  ;;  %s2071_s8 = sshll.u32 %s384_s10, 5 }
  0x3f   : > { %s2630_s17 = scalar_lea.vmem %s2983_s1, %s2068_s15  ;;  %s392_s21 = scalar_lea.vmem %s2984_s2, %s2068_s15 }
  0x40   : > { %s397_s9 = scalar_lea.vmem %s2985_s3, %s2068_s15  ;;  %s402_s24 = scalar_lea.vmem %s2986_s4, %s2071_s8 }
  0x42   : > { %v409_v0 = vld [vmem:[#allocation5] sm:$0xff]  ;;  %vm411_vm0 = vcmask 261120   ;;  %v410_v1 = vld [vmem:[#allocation5 + $0x8] sm:$0xff] }
  0x43   : > { %412 = vst.msk [vmem:[#allocation2] sm:$0xff] %vm411_vm0, %v409_v0  ;;  %413 = vst.msk [vmem:[#allocation2 + $0x8] sm:$0xff] %vm411_vm0, %v410_v1 }
  0x44 PF: > { %v2642_v2 = vld [vmem:[%s392_s21] sm:$0xf]  ;;  %v2644_v3 = vld [vmem:[%s392_s21 + $0x4] sm:$0xf]  ;;  %v2646_v4 = vld [vmem:[%s392_s21 + $0x8] sm:$0xf]  ;;  %v438_v24 = vlaneseq }
  0x45   : > { %v2648_v5 = vld [vmem:[%s392_s21 + $0xc] sm:$0xf]  ;;  %v2650_v6 = vld [vmem:[%s397_s9] sm:$0xf]  ;;  %v2652_v7 = vld [vmem:[%s397_s9 + $0x4] sm:$0xf] }
  0x46   : > { %v2654_v8 = vld [vmem:[%s397_s9 + $0x8] sm:$0xf]  ;;  %v2656_v9 = vld [vmem:[%s397_s9 + $0xc] sm:$0xf]  ;;  %v2658_v10 = vld [vmem:[%s402_s24] sm:$0xf] }
  0x47   : > { %v2660_v11 = vld [vmem:[%s402_s24 + $0x4] sm:$0xf]  ;;  %v2662_v12 = vld [vmem:[%s402_s24 + $0x8] sm:$0xf]  ;;  %v2664_v13 = vld [vmem:[%s402_s24 + $0xc] sm:$0xf] }
  0x48   : > { %v2666_v14 = vld [vmem:[%s402_s24 + $0x10] sm:$0xf]  ;;  %v2668_v15 = vld [vmem:[%s402_s24 + $0x14] sm:$0xf]  ;;  %v2670_v16 = vld [vmem:[%s402_s24 + $0x18] sm:$0xf] }
  0x49   : > { %v2672_v17 = vld [vmem:[%s402_s24 + $0x1c] sm:$0xf]  ;;  %v2285_v18 = vld [vmem:[%s2630_s17 + $0x8] sm:$0xff]   ;;  %v2465_v19 = vmov 0.0   ;;  %v2286_v20 = vld [vmem:[%s2630_s17] sm:$0xff]   ;;  %vm2466_vm1 = vmmov 0  }
  0x4a   : > { %2102 = vmatprep.subr.bf16.mxu0 %v2465_v19  ;;  %v2677_v21 = vld [vmem:[#allocation2] sm:$0xff]  ;;  %v2679_v22 = vld [vmem:[#allocation2 + $0x8] sm:$0xff]  ;;  %2106 = vmatprep.mubr.msk.bf16.mxu0 %vm2466_vm1, %v2465_v19  ;;  %vm454_vm2 = vcmask 261120   ;;  %v2687_v25 = vshrl.u32 %v438_v24, 7  ;;  %s2996_s24 = scalar_lea.vmem [#allocation8], %s2618_s30  ;;  %vm499_vm3 = vcmask 785408  }
  0x4b   : > { %2103 = vmatpush3.bf16.msra.mxu0 %v2285_v18  ;;  %v437_v23 = vpack.c.bf16 %v2679_v22, %v2677_v21  ;;  %v2692_v27 = vld [vmem:[%s2996_s24] sm:$0xff]  ;;  %s2697_s10 = smov 0  }
  0x4c   : > { %2104 = vmatprep.subr.bf16.mxu0 %v2465_v19  ;;  %v440_v26 = vsub.s32 0, %v2687_v25 }
  0x4e   : > { %v441_v28 = vrot.slane %v2692_v27, %v440_v26 }
  0x4f   : > { %2105 = vmatpush3.bf16.msra.mxu0 %v2286_v20 }
  0x52   : > { %2107 = vmatmul.mubr.msk.bf16.vlgmr.msra.gmra.mxu0 %vm454_vm2, %v437_v23 }
 0x112   : > { %v492_v29 = vpop.f32.mrf.mxu0 }
 0x113   : > { %v493_v30 = vadd.f32 %v492_v29, %v441_v28 }
 0x114   : > { %v2108_v31 = vpop.f32.mrf.mxu0 }
 0x115   : > { %500 = vst.msk [vmem:[#allocation3] sm:$0xff] %vm499_vm3, %v493_v30 }
 0x116   : > { %v495_v32 = vpop.f32.mrf.mxu0 }
 0x117   : > { %v496_v33 = vadd.f32 %v495_v32, %v441_v28 }
 0x118   : > { %v2109_v34 = vpop.f32.mrf.mxu0 }
 0x119   : > { %501 = vst.msk [vmem:[#allocation3 + $0x8] sm:$0xff] %vm499_vm3, %v496_v33 }
 0x11a LB: >> { %s2035_s30 = sshll.u32 %s2459_s10, 3  ;;  %s2467_s8 = smov 104   ;;  %v2471_v37 = vmov 0.0   ;;  %vm2472_vm4 = vmmov 0   ;;  %v2473_v40 = vmov 1983009808   ;;  %s2459_s10 = sphi %s2697_s10, %s507_s10  }
 0x11b   : >> { %s509_s15 = scalar_lea.vmem [#allocation3], %s2035_s30  ;;  %s2468_s12 = smov 120   ;;  %2110 = vmatprep.subr.bf16.mxu0 %v2471_v37  ;;  %2116 = vmatprep.subr.bf16.mxu1 %v2471_v37  ;;  %v524_v41 = vunpack.c.l.s4 %v2473_v40  ;;  %v2474_v43 = vmov 1934713408   ;;  %vm961_vm5 = vcmask 64512   ;;  %vm1205_vm6 = vcmask 1043456  }
 0x11c   : >> { %s2469_s16 = smov 112   ;;  %s2470_s17 = smov 96   ;;  %2112 = vmatprep.mubr.msk.bf16.mxu0 %vm2472_vm4, %v2471_v37  ;;  %2118 = vmatprep.mubr.msk.bf16.mxu1 %vm2472_vm4, %v2471_v37  ;;  %v556_v44 = vunpack.c.l.s4 %v2474_v43  ;;  %vm1536_vm7 = vcmask 130048   ;;  %vm1538_vm8 = vcmask 195584  }
 0x11d   : >> { %v525_v42 = vunpack.c.0.s8 %v524_v41  ;;  %s2475_s18 = smov 64   ;;  %s2476_s19 = smov 16  }
 0x11e   : >> { %v557_v50 = vunpack.c.0.s8 %v556_v44  ;;  %s2477_s21 = smov 8   ;;  %s2478_s20 = smov 24  }
 0x11f   : >> { %v2731_v47 = vsub.s32 %v525_v42, %v2687_v25  ;;  %s1540_s13 = scalar_lea.vmem [#allocation4], %s2035_s30  ;;  %s507_s10 = sadd.s32 1, %s2459_s10  }
 0x120   : >> { %v2705_v35 = vld [vmem:[%s509_s15] sm:$0xff]  ;;  %v2742_v57 = vsub.s32 %v557_v50, %v2687_v25  ;;  %p504_p4 = scmp.ge.s32.totalorder %s507_s10, 2  }
 0x121   : >> { %518 = vrot.lane.b32.xlu1 %v2705_v35, %s2467_s8  ;;  %512 = vrot.lane.b32.xlu0 %v2705_v35, %s2468_s12  ;;  %vm1738_vm9 = vcmask (%p504_p4), 523264   ;;  %p2063_p10 = scmp.ne.s32.totalorder (%p504_p4), %s2447_s27, 1 }
 0x125   : >> { %515 = vrot.lane.b32.xlu0 %v2705_v35, %s2469_s16  ;;  %657 = vrot.lane.b32.xlu1 %v2705_v35, %s2470_s17 }
 0x193   : >> { %v2711_v36 = vpop.permute.xlu0 %512  ;;  %v2716_v38 = vpop.permute.xlu1 %518 }
 0x194   : >> { %659 = vrot.lane.b32.xlu0 %v2711_v36, %s2470_s17  ;;  %v537_v48 = vcombine.low %v2711_v36, %v2716_v38  ;;  %v538_v49 = vcombine.high %v2711_v36, %v2716_v38 }
 0x196   : >> { %v545_v54 = vrot.slane %v537_v48, %v2731_v47  ;;  %v552_v55 = vrot.slane %v538_v49, %v2731_v47 }
 0x197   : >> { %v2718_v39 = vpop.permute.xlu0 %515  ;;  %v658_v53 = vpop.permute.xlu1 %657 }
 0x198   : >> { %663 = vrot.lane.b32.xlu0 %v2716_v38, %s2470_s17  ;;  %661 = vrot.lane.b32.xlu1 %v2718_v39, %s2470_s17  ;;  %v521_v45 = vcombine.low %v2705_v35, %v2718_v39  ;;  %v522_v46 = vcombine.high %v2705_v35, %v2718_v39 }
 0x19a   : >> { %v529_v51 = vrot.slane %v521_v45, %v2731_v47  ;;  %v536_v52 = vrot.slane %v522_v46, %v2731_v47 }
 0x19c   : >> { %v553_v58 = vcombine.low %v529_v51, %v545_v54  ;;  %v554_v59 = vcombine.high %v529_v51, %v545_v54  ;;  %v569_v60 = vcombine.low %v536_v52, %v552_v55  ;;  %v570_v61 = vcombine.high %v536_v52, %v552_v55 }
 0x19e   : >> { %v561_v23 = vrot.slane %v553_v58, %v2742_v57  ;;  %v568_v24 = vrot.slane %v554_v59, %v2742_v57  ;;  %v577_v28 = vrot.slane %v569_v60, %v2742_v57  ;;  %v584_v29 = vrot.slane %v570_v61, %v2742_v57 }
 0x1a0   : >> { %v589_v43 = vcombine.low %v561_v23, %v568_v24  ;;  %v2036_v44 = vcombine.high %v561_v23, %v568_v24  ;;  %v605_v45 = vcombine.low %v577_v28, %v584_v29  ;;  %v2037_v46 = vcombine.high %v577_v28, %v584_v29 }
 0x1a2   : >> { %v604_v58 = vrot.slane %v2036_v44, %v2731_v47  ;;  %v612_v59 = vrot.slane %v605_v45, %v2731_v47  ;;  %v620_v60 = vrot.slane %v2037_v46, %v2731_v47 }
 0x206   : >> { %v660_v56 = vpop.permute.xlu0 %659 }
 0x20a   : >> { %v662_v62 = vpop.permute.xlu1 %661  ;;  %v664_v63 = vpop.permute.xlu0 %663 }
 0x20b   : >> { %v669_v0 = vcombine.low %v658_v53, %v662_v62  ;;  %v670_v1 = vcombine.high %v658_v53, %v662_v62  ;;  %v685_v18 = vcombine.low %v660_v56, %v664_v63  ;;  %v686_v20 = vcombine.high %v660_v56, %v664_v63 }
 0x20c   : >> { %v596_v56 = vrot.slane %v589_v43, %v2731_v47 }
 0x20d   : >> { %v677_v30 = vrot.slane %v669_v0, %v2731_v47  ;;  %v684_v31 = vrot.slane %v670_v1, %v2731_v47  ;;  %v693_v32 = vrot.slane %v685_v18, %v2731_v47  ;;  %v700_v33 = vrot.slane %v686_v20, %v2731_v47 }
 0x20e   : >> { %v621_v29 = vcombine.low %v596_v56, %v604_v58 }
 0x20f   : >> { %v701_v34 = vcombine.low %v677_v30, %v693_v32  ;;  %v702_v40 = vcombine.high %v677_v30, %v693_v32  ;;  %v717_v41 = vcombine.low %v684_v31, %v700_v33  ;;  %v718_v42 = vcombine.high %v684_v31, %v700_v33 }
 0x210   : >> { %v637_v30 = vcombine.low %v612_v59, %v620_v60 }
 0x211   : >> { %v709_v48 = vrot.slane %v701_v34, %v2742_v57  ;;  %v716_v49 = vrot.slane %v702_v40, %v2742_v57  ;;  %v725_v50 = vrot.slane %v717_v41, %v2742_v57  ;;  %v732_v51 = vrot.slane %v718_v42, %v2742_v57 }
 0x212   : >> { %v629_v42 = vrot.slane %v621_v29, %v2742_v57  ;;  %v645_v43 = vrot.slane %v637_v30, %v2742_v57 }
 0x213   : >> { %v737_v52 = vcombine.low %v709_v48, %v716_v49  ;;  %v2038_v53 = vcombine.high %v709_v48, %v716_v49  ;;  %v753_v54 = vcombine.low %v725_v50, %v732_v51  ;;  %v2039_v55 = vcombine.high %v725_v50, %v732_v51 }
 0x214   : >> { %v622_v49 = vcombine.high %v596_v56, %v604_v58  ;;  %v638_v50 = vcombine.high %v612_v59, %v620_v60  ;;  %v653_v51 = vcombine.low %v629_v42, %v645_v43 }
 0x215   : >> { %v744_v61 = vrot.slane %v737_v52, %v2731_v47  ;;  %v752_v62 = vrot.slane %v2038_v53, %v2731_v47  ;;  %v760_v63 = vrot.slane %v753_v54, %v2731_v47  ;;  %v768_v0 = vrot.slane %v2039_v55, %v2731_v47 }
 0x216   : >> { %v654_v52 = vcombine.high %v629_v42, %v645_v43  ;;  %v953_v55 = vpack.c.bf16 %v653_v51, %v653_v51 }
 0x217   : >> { %v769_v1 = vcombine.low %v744_v61, %v752_v62  ;;  %v785_v18 = vcombine.low %v760_v63, %v768_v0  ;;  %v770_v20 = vcombine.high %v744_v61, %v752_v62  ;;  %v786_v23 = vcombine.high %v760_v63, %v768_v0 }
 0x218   : >> { %v954_v61 = vpack.c.bf16 %v654_v52, %v654_v52  ;;  %v636_v62 = vrot.slane %v622_v49, %v2742_v57  ;;  %v652_v63 = vrot.slane %v638_v50, %v2742_v57 }
 0x219   : >> { %v777_v24 = vrot.slane %v769_v1, %v2742_v57  ;;  %v793_v28 = vrot.slane %v785_v18, %v2742_v57  ;;  %v784_v33 = vrot.slane %v770_v20, %v2742_v57  ;;  %v800_v34 = vrot.slane %v786_v23, %v2742_v57 }
 0x21a   : >> { %v655_v59 = vcombine.low %v636_v62, %v652_v63  ;;  %v656_v60 = vcombine.high %v636_v62, %v652_v63 }
 0x21b   : >> { %v801_v31 = vcombine.low %v777_v24, %v793_v28  ;;  %v802_v32 = vcombine.high %v777_v24, %v793_v28  ;;  %v803_v46 = vcombine.low %v784_v33, %v800_v34  ;;  %v804_v48 = vcombine.high %v784_v33, %v800_v34 }
 0x21c   : >> { %v955_v0 = vpack.c.bf16 %v655_v59, %v655_v59  ;;  %v956_v1 = vpack.c.bf16 %v656_v60, %v656_v60 }
 0x21d   : >> { %v957_v40 = vpack.c.bf16 %v801_v31, %v801_v31  ;;  %v958_v41 = vpack.c.bf16 %v802_v32, %v802_v32  ;;  %v959_v53 = vpack.c.bf16 %v803_v46, %v803_v46  ;;  %v960_v54 = vpack.c.bf16 %v804_v48, %v804_v48 }
 0x21f   : >> { %v966_v44 = vsel %vm961_vm5, %v957_v40, 0  ;;  %v1012_v45 = vsel %vm961_vm5, %v958_v41, 0  ;;  %v1058_v56 = vsel %vm961_vm5, %v959_v53, 0  ;;  %v1104_v58 = vsel %vm961_vm5, %v960_v54, 0 }
 0x220   : >> { %2111 = vmatpush3.bf16.xpose.msra.mxu0 %v966_v44  ;;  %2117 = vmatpush3.bf16.xpose.msra.mxu1 %v1012_v45 }
 0x221   : >> { %2122 = vmatprep.subr.bf16.mxu0 %v2471_v37  ;;  %2128 = vmatprep.subr.bf16.mxu1 %v2471_v37 }
 0x227   : >> { %2113 = vmatmul.mubr.msk.bf16.vlgmr.msra.gmra.mxu0 %vm961_vm5, %v953_v55  ;;  %2119 = vmatmul.mubr.msk.bf16.vlgmr.msra.gmra.mxu1 %vm961_vm5, %v954_v61 }
 0x228   : >> { %2123 = vmatpush3.bf16.xpose.msra.mxu0 %v1058_v56  ;;  %2129 = vmatpush3.bf16.xpose.msra.mxu1 %v1104_v58 }
 0x229   : >> { %2124 = vmatprep.mubr.msk.bf16.mxu0 %vm2472_vm4, %v2471_v37  ;;  %2130 = vmatprep.mubr.msk.bf16.mxu1 %vm2472_vm4, %v2471_v37 }
 0x22a   : >> { %2134 = vmatprep.subr.bf16.mxu0 %v2471_v37  ;;  %2140 = vmatprep.subr.bf16.mxu1 %v2471_v37 }
 0x22f   : >> { %2125 = vmatmul.mubr.msk.bf16.vlgmr.msra.gmra.mxu0 %vm961_vm5, %v955_v0  ;;  %2131 = vmatmul.mubr.msk.bf16.vlgmr.msra.gmra.mxu1 %vm961_vm5, %v956_v1 }
 0x230   : >> { %2136 = vmatprep.mubr.msk.bf16.mxu0 %vm2472_vm4, %v2471_v37  ;;  %2142 = vmatprep.mubr.msk.bf16.mxu1 %vm2472_vm4, %v2471_v37 }
 0x2e7   : >> { %v1002_v18 = vpop.f32.mrf.mxu0  ;;  %v1048_v20 = vpop.f32.mrf.mxu1 }
 0x2e8   : >> { %v1146_v23 = vmul.f32 0.35355338, %v1002_v18  ;;  %v1147_v24 = vmul.f32 0.35355338, %v1048_v20 }
 0x2e9   : >> { %v2114_v28 = vpop.f32.mrf.mxu0  ;;  %v2120_v29 = vpop.f32.mrf.mxu1 }
 0x2ea   : >> { %v1153_v30 = vsel %vm961_vm5, %v1147_v24, -inf  ;;  %v1150_v31 = vsel %vm961_vm5, %v1146_v23, -inf }
 0x2eb   : >> { %1154 = vmax.xlane.f32.xlu0 %v1153_v30  ;;  %v1051_v32 = vpop.f32.mrf.mxu1  ;;  %1151 = vmax.xlane.f32.xlu1 %v1150_v31  ;;  %v1005_v33 = vpop.f32.mrf.mxu0 }
 0x2ed   : >> { %v2115_v34 = vpop.f32.mrf.mxu0  ;;  %v2121_v40 = vpop.f32.mrf.mxu1 }
 0x2ef   : >> { %v1094_v41 = vpop.f32.mrf.mxu0  ;;  %v1140_v42 = vpop.f32.mrf.mxu1 }
 0x2f0   : >> { %v1148_v43 = vmul.f32 0.35355338, %v1094_v41  ;;  %v1149_v44 = vmul.f32 0.35355338, %v1140_v42 }
 0x2f1   : >> { %v2126_v45 = vpop.f32.mrf.mxu0  ;;  %v2132_v46 = vpop.f32.mrf.mxu1 }
 0x2f2   : >> { %v1159_v48 = vsel %vm961_vm5, %v1149_v44, -inf  ;;  %v1156_v49 = vsel %vm961_vm5, %v1148_v43, -inf }
 0x2f3   : >> { %v1143_v50 = vpop.f32.mrf.mxu1  ;;  %1160 = vmax.xlane.f32.xlu1 %v1159_v48  ;;  %1157 = vmax.xlane.f32.xlu0 %v1156_v49  ;;  %v1097_v51 = vpop.f32.mrf.mxu0 }
 0x2f5   : >> { %v2127_v52 = vpop.f32.mrf.mxu0  ;;  %v2133_v53 = vpop.f32.mrf.mxu1 }
 0x304   : >> { %807 = vrot.lane.b32.xlu1 %v2711_v36, %s2475_s18 }
 0x309   : >> { %805 = vrot.lane.b32.xlu0 %v2705_v35, %s2475_s18 }
 0x374   : >> { %v1155_v54 = vpop.xlane.xlu0 %1154  ;;  %v1152_v55 = vpop.xlane.xlu1 %1151 }
 0x375   : >> { %v1163_v61 = vsub.f32 %v1147_v24, %v1155_v54  ;;  %v1162_v62 = vsub.f32 %v1146_v23, %v1152_v55 }
 0x377   : >> { %v1168_v63 = vmul.f32 1.442695, %v1163_v61  ;;  %v1166_v56 = vmul.f32 1.442695, %v1162_v62 }
 0x379   : >> { %2287 = vpow2.f32 %v1168_v63 }
 0x37a   : >> { %2289 = vpow2.f32 %v1166_v56 }
 0x37c   : >> { %v1158_v35 = vpop.xlane.xlu0 %1157  ;;  %v1161_v0 = vpop.xlane.xlu1 %1160 }
 0x37d   : >> { %v1164_v1 = vsub.f32 %v1148_v43, %v1158_v35  ;;  %v1165_v18 = vsub.f32 %v1149_v44, %v1161_v0 }
 0x37f   : >> { %v1170_v20 = vmul.f32 1.442695, %v1164_v1  ;;  %v1172_v23 = vmul.f32 1.442695, %v1165_v18 }
 0x380   : >> { %v806_v30 = vpop.permute.xlu0 %805 }
 0x381   : >> { %2291 = vpow2.f32 %v1170_v20 }
 0x382   : >> { %2293 = vpow2.f32 %v1172_v23 }
 0x386   : >> { %v2798_v58 = vpop.eup %2287 }
 0x387   : >> { %v2800_v59 = vpop.eup %2289  ;;  %v1177_v60 = vsel %vm961_vm5, %v2798_v58, 0.0 }
 0x388   : >> { %1178 = vadd.xlane.f32.xlu1 %v1177_v60  ;;  %v1174_v36 = vsel %vm961_vm5, %v2800_v59, 0.0 }
 0x389   : >> { %1175 = vadd.xlane.f32.xlu0 %v1174_v36 }
 0x38e   : >> { %v2808_v24 = vpop.eup %2291 }
 0x38f   : >> { %v2810_v28 = vpop.eup %2293  ;;  %v1180_v29 = vsel %vm961_vm5, %v2808_v24, 0.0 }
 0x399   : >> { %809 = vrot.lane.b32.xlu1 %v2718_v39, %s2475_s18  ;;  %v1183_v39 = vsel %vm961_vm5, %v2810_v28, 0.0 }
 0x39f   : >> { %811 = vrot.lane.b32.xlu0 %v2716_v38, %s2475_s18  ;;  %v808_v38 = vpop.permute.xlu1 %807 }
 0x3bd   : >> { %1181 = vadd.xlane.f32.xlu1 %v1180_v29 }
 0x3be   : >> { %1184 = vadd.xlane.f32.xlu0 %v1183_v39 }
 0x411   : >> { %v1179_v31 = vpop.xlane.xlu1 %1178 }
 0x412   : >> { %v1176_v32 = vpop.xlane.xlu0 %1175  ;;  %2295 = vrcp.f32 %v1179_v31 }
 0x413   : >> { %2297 = vrcp.f32 %v1176_v32 }
 0x415   : >> { %v810_v33 = vpop.permute.xlu1 %809 }
 0x416   : >> { %v817_v34 = vcombine.low %v806_v30, %v810_v33  ;;  %v818_v40 = vcombine.high %v806_v30, %v810_v33  ;;  %v812_v41 = vpop.permute.xlu0 %811 }
 0x417   : >> { %v833_v42 = vcombine.low %v808_v38, %v812_v41  ;;  %v834_v43 = vcombine.high %v808_v38, %v812_v41 }
 0x418   : >> { %v825_v44 = vrot.slane %v817_v34, %v2731_v47  ;;  %v832_v45 = vrot.slane %v818_v40, %v2731_v47 }
 0x419   : >> { %v841_v46 = vrot.slane %v833_v42, %v2731_v47  ;;  %v848_v48 = vrot.slane %v834_v43, %v2731_v47 }
 0x41b   : >> { %v849_v49 = vcombine.low %v825_v44, %v841_v46  ;;  %v850_v50 = vcombine.high %v825_v44, %v841_v46  ;;  %v865_v51 = vcombine.low %v832_v45, %v848_v48  ;;  %v866_v52 = vcombine.high %v832_v45, %v848_v48 }
 0x41d   : >> { %v857_v53 = vrot.slane %v849_v49, %v2742_v57  ;;  %v864_v54 = vrot.slane %v850_v50, %v2742_v57  ;;  %v873_v55 = vrot.slane %v865_v51, %v2742_v57  ;;  %v880_v61 = vrot.slane %v866_v52, %v2742_v57 }
 0x41f   : >> { %v885_v62 = vcombine.low %v857_v53, %v864_v54  ;;  %v2040_v63 = vcombine.high %v857_v53, %v864_v54  ;;  %v901_v56 = vcombine.low %v873_v55, %v880_v61  ;;  %v2041_v60 = vcombine.high %v873_v55, %v880_v61  ;;  %v2296_v39 = vpop.eup %2295 }
 0x420   : >> { %v2298_v33 = vpop.eup %2297  ;;  %v1191_v46 = vmul.f32 %v2296_v39, %v2798_v58 }
 0x421   : >> { %v892_v36 = vrot.slane %v885_v62, %v2731_v47  ;;  %v900_v35 = vrot.slane %v2040_v63, %v2731_v47  ;;  %v908_v0 = vrot.slane %v901_v56, %v2731_v47  ;;  %v916_v1 = vrot.slane %v2041_v60, %v2731_v47 }
 0x422   : >> { %v1190_v45 = vmul.f32 %v2298_v33, %v2800_v59  ;;  %v1195_v53 = vpack.c.bf16 %v1191_v46, %v1191_v46 }
 0x423   : >> { %v917_v18 = vcombine.low %v892_v36, %v900_v35  ;;  %v933_v20 = vcombine.low %v908_v0, %v916_v1  ;;  %v918_v23 = vcombine.high %v892_v36, %v900_v35  ;;  %v934_v29 = vcombine.high %v908_v0, %v916_v1 }
 0x424   : >> { %v1194_v52 = vpack.c.bf16 %v1190_v45, %v1190_v45 }
 0x425   : >> { %v925_v38 = vrot.slane %v917_v18, %v2742_v57  ;;  %v941_v30 = vrot.slane %v933_v20, %v2742_v57  ;;  %v932_v31 = vrot.slane %v918_v23, %v2742_v57  ;;  %v948_v32 = vrot.slane %v934_v29, %v2742_v57 }
 0x427   : >> { %v949_v34 = vcombine.low %v925_v38, %v941_v30  ;;  %v950_v40 = vcombine.high %v925_v38, %v941_v30  ;;  %v951_v41 = vcombine.low %v932_v31, %v948_v32  ;;  %v952_v42 = vcombine.high %v932_v31, %v948_v32 }
 0x429   : >> { %v1198_v43 = vpack.c.bf16 %v949_v34, %v949_v34  ;;  %v1199_v44 = vpack.c.bf16 %v950_v40, %v950_v40  ;;  %v1200_v50 = vpack.c.bf16 %v951_v41, %v951_v41  ;;  %v1201_v51 = vpack.c.bf16 %v952_v42, %v952_v42 }
 0x42b   : >> { %v1207_v48 = vsel %vm1205_vm6, %v1198_v43, 0  ;;  %v1253_v49 = vsel %vm1205_vm6, %v1199_v44, 0  ;;  %v1299_v58 = vsel %vm1205_vm6, %v1200_v50, 0  ;;  %v1345_v59 = vsel %vm1205_vm6, %v1201_v51, 0 }
 0x42c   : >> { %2135 = vmatpush3.bf16.msra.mxu0 %v1207_v48  ;;  %2141 = vmatpush3.bf16.msra.mxu1 %v1253_v49 }
 0x42d   : >> { %2146 = vmatprep.subr.bf16.mxu0 %v2471_v37  ;;  %2152 = vmatprep.subr.bf16.mxu1 %v2471_v37 }
 0x42f   : >> { %2137 = vmatmul.mubr.msk.bf16.vlgmr.msra.gmra.mxu0 %vm961_vm5, %v1194_v52  ;;  %2143 = vmatmul.mubr.msk.bf16.vlgmr.msra.gmra.mxu1 %vm961_vm5, %v1195_v53 }
 0x430   : >> { %2147 = vmatpush3.bf16.msra.mxu0 %v1299_v58  ;;  %2153 = vmatpush3.bf16.msra.mxu1 %v1345_v59 }
 0x431   : >> { %2148 = vmatprep.mubr.msk.bf16.mxu0 %vm2472_vm4, %v2471_v37  ;;  %2154 = vmatprep.mubr.msk.bf16.mxu1 %vm2472_vm4, %v2471_v37 }
 0x432   : > { %2158 = vmatprep.subr.bf16.mxu1 (%p504_p4), %v2465_v19  ;;  %2174 = vmatprep.subr.bf16.mxu0 (%p504_p4), %v2465_v19 }
 0x446   : >> { %v1182_v54 = vpop.xlane.xlu1 %1181 }
 0x447   : >> { %2299 = vrcp.f32 %v1182_v54  ;;  %v1185_v55 = vpop.xlane.xlu0 %1184 }
 0x448   : >> { %2301 = vrcp.f32 %v1185_v55 }
 0x454   : >> { %v2300_v61 = vpop.eup %2299 }
 0x455   : >> { %v2302_v62 = vpop.eup %2301  ;;  %v1192_v63 = vmul.f32 %v2300_v61, %v2808_v24 }
 0x456   : >> { %v1193_v56 = vmul.f32 %v2302_v62, %v2810_v28 }
 0x457   : >> { %v1196_v60 = vpack.c.bf16 %v1192_v63, %v1192_v63 }
 0x458   : >> { %v1197_v36 = vpack.c.bf16 %v1193_v56, %v1193_v56 }
 0x459   : >> { %2149 = vmatmul.mubr.msk.bf16.vlgmr.msra.gmra.mxu0 %vm961_vm5, %v1196_v60 }
 0x45a   : >> { %2155 = vmatmul.mubr.msk.bf16.vlgmr.msra.gmra.mxu1 %vm961_vm5, %v1197_v36  ;;  %2182 = vmatprep.mubr.msk.bf16.mxu0 (%p504_p4), %vm2466_vm1, %v2465_v19 }
 0x45b   : > { %2162 = vmatprep.mubr.msk.bf16.mxu1 (%p504_p4), %vm2466_vm1, %v2465_v19 }
 0x4ef   : >> { %v1243_v35 = vpop.f32.mrf.mxu0  ;;  %v1289_v0 = vpop.f32.mrf.mxu1 }
 0x4f1   : >> { %v2138_v1 = vpop.f32.mrf.mxu0  ;;  %v2144_v37 = vpop.f32.mrf.mxu1 }
 0x4f3   : >> { %v1246_v18 = vpop.f32.mrf.mxu0  ;;  %v1292_v20 = vpop.f32.mrf.mxu1 }
 0x4f5   : >> { %v2139_v23 = vpop.f32.mrf.mxu0  ;;  %v2145_v29 = vpop.f32.mrf.mxu1 }
 0x519   : >> { %v1335_v39 = vpop.f32.mrf.mxu0 }
 0x51a   : >> { %v1387_v38 = vcombine.low %v1243_v35, %v1335_v39  ;;  %v1388_v30 = vcombine.high %v1243_v35, %v1335_v39  ;;  %v1381_v24 = vpop.f32.mrf.mxu1 }
 0x51b   : >> { %v1403_v31 = vcombine.low %v1289_v0, %v1381_v24  ;;  %v1404_v28 = vcombine.high %v1289_v0, %v1381_v24  ;;  %v2150_v32 = vpop.f32.mrf.mxu0 }
 0x51c   : >> { %v1395_v33 = vrot.slane %v1387_v38, %v2731_v47  ;;  %v1402_v34 = vrot.slane %v1388_v30, %v2731_v47  ;;  %v2156_v40 = vpop.f32.mrf.mxu1 }
 0x51d   : >> { %v1411_v41 = vrot.slane %v1403_v31, %v2731_v47  ;;  %v1418_v42 = vrot.slane %v1404_v28, %v2731_v47  ;;  %v1338_v43 = vpop.f32.mrf.mxu0  ;;  %v2052_v40 = vcombine.low (%p504_p4), %v2642_v2, %v2644_v3 }
 0x51e   : >> { %v1384_v44 = vpop.f32.mrf.mxu1 }
 0x51f   : >> { %v1419_v45 = vcombine.low %v1395_v33, %v1411_v41  ;;  %v1420_v46 = vcombine.high %v1395_v33, %v1411_v41  ;;  %v1435_v48 = vcombine.low %v1402_v34, %v1418_v42  ;;  %v1436_v49 = vcombine.high %v1402_v34, %v1418_v42  ;;  %v2151_v50 = vpop.f32.mrf.mxu0 }
 0x520   : >> { %v2157_v51 = vpop.f32.mrf.mxu1  ;;  %v2053_v34 = vcombine.low (%p504_p4), %v2646_v4, %v2648_v5  ;;  %v1547_v4 = vsub.s32 (%p504_p4), 1, %v2687_v25 }
 0x521   : >> { %v1427_v52 = vrot.slane %v1419_v45, %v2742_v57  ;;  %v1434_v53 = vrot.slane %v1420_v46, %v2742_v57  ;;  %v1443_v58 = vrot.slane %v1435_v48, %v2742_v57  ;;  %v1450_v59 = vrot.slane %v1436_v49, %v2742_v57 }
 0x522   : > { %2159 = vmatpush3.bf16.msra.mxu1 (%p504_p4), %v2053_v34  ;;  %v1548_v5 = vrot.slane (%p504_p4), %v2692_v27, %v1547_v4 }
 0x523   : >> { %v1455_v54 = vcombine.low %v1427_v52, %v1434_v53  ;;  %v2050_v55 = vcombine.high %v1427_v52, %v1434_v53  ;;  %v1471_v61 = vcombine.low %v1443_v58, %v1450_v59  ;;  %v2051_v62 = vcombine.high %v1443_v58, %v1450_v59  ;;  %2160 = vmatprep.subr.bf16.mxu1 (%p504_p4), %v2465_v19 }
 0x525   : >> { %v1462_v63 = vrot.slane %v1455_v54, %v2731_v47  ;;  %v1470_v56 = vrot.slane %v2050_v55, %v2731_v47  ;;  %v1478_v60 = vrot.slane %v1471_v61, %v2731_v47  ;;  %v1486_v36 = vrot.slane %v2051_v62, %v2731_v47 }
 0x526   : > { %2161 = vmatpush3.bf16.msra.mxu1 (%p504_p4), %v2052_v40 }
 0x527   : >> { %v1488_v35 = vcombine.high %v1462_v63, %v1470_v56  ;;  %v1504_v0 = vcombine.high %v1478_v60, %v1486_v36  ;;  %v1487_v1 = vcombine.low %v1462_v63, %v1470_v56  ;;  %v1503_v37 = vcombine.low %v1478_v60, %v1486_v36  ;;  %2166 = vmatprep.subr.bf16.mxu1 (%p504_p4), %v2465_v19 }
 0x528   : > { %v2055_v60 = vcombine.low (%p504_p4), %v2650_v6, %v2652_v7  ;;  %v2061_v36 = vcombine.low (%p504_p4), %v2670_v16, %v2672_v17 }
 0x529   : >> { %v1502_v18 = vrot.slane %v1488_v35, %v2742_v57  ;;  %v1518_v20 = vrot.slane %v1504_v0, %v2742_v57  ;;  %v1495_v23 = vrot.slane %v1487_v1, %v2742_v57  ;;  %v1511_v29 = vrot.slane %v1503_v37, %v2742_v57 }
 0x52a   : > { %2175 = vmatpush3.bf16.msra.mxu0 (%p504_p4), %v2061_v36 }
 0x52b   : >> { %v1521_v39 = vcombine.low %v1502_v18, %v1518_v20  ;;  %v1520_v38 = vcombine.high %v1495_v23, %v1511_v29  ;;  %v1519_v30 = vcombine.low %v1495_v23, %v1511_v29  ;;  %v1522_v47 = vcombine.high %v1502_v18, %v1518_v20  ;;  %2176 = vmatprep.subr.bf16.mxu0 (%p504_p4), %v2465_v19 }
 0x52c   : > { %v1642_v23 = vsub.s32 (%p504_p4), 5, %v2687_v25 }
 0x52d   : >> { %1528 = vrot.lane.b32.xlu1 %v1521_v39, %s2476_s19  ;;  %1524 = vrot.lane.b32.xlu0 %v1520_v38, %s2477_s21 }
 0x52e   : > { %v1643_v39 = vrot.slane (%p504_p4), %v2692_v27, %v1642_v23 }
 0x531   : >> { %1532 = vrot.lane.b32.xlu1 %v1522_v47, %s2478_s20 }
 0x59f   : >> { %v1529_v24 = vpop.permute.xlu1 %1528  ;;  %v1525_v31 = vpop.permute.xlu0 %1524 }
 0x5a0   : >> { %v1535_v28 = vsel %vm961_vm5, %v1519_v30, %v1525_v31  ;;  %v2060_v31 = vcombine.low (%p504_p4), %v2666_v14, %v2668_v15 }
 0x5a1   : >> { %v1537_v33 = vsel %vm1536_vm7, %v1535_v28, %v1529_v24  ;;  %506 = sbr.rel (!%p504_p4) target bundleno = 282 (0x11a), region = 121  ;;  %v2059_v28 = vcombine.low (%p504_p4), %v2662_v12, %v2664_v13  ;;  %v1712_v13 = vsub.s32 (%p504_p4), 3, %v2687_v25 }
 0x5a2   : > { %2177 = vmatpush3.bf16.msra.mxu0 (%p504_p4), %v2060_v31 }
 0x5a3   : >> { %v1533_v32 = vpop.permute.xlu1 %1532  ;;  %2178 = vmatprep.subr.bf16.mxu0 (%p504_p4), %v2465_v19 }
 0x5a4   : >> { %v1539_v57 = vsel %vm1538_vm8, %v1537_v33, %v1533_v32  ;;  %v2058_v32 = vcombine.low (%p504_p4), %v2658_v10, %v2660_v11  ;;  %v1649_v33 = vsub.s32 (%p504_p4), 2, %v2687_v25  ;;  %v1713_v10 = vrot.slane (%p504_p4), %v2692_v27, %v1712_v13 }
 0x5a5   : >> { %1541 = vst.msk [vmem:[%s1540_s13] sm:$0xff] %vm454_vm2, %v1539_v57 }
 0x5a6   : > { %2179 = vmatpush3.bf16.msra.mxu0 %v2059_v28  ;;  %v1650_v57 = vrot.slane %v2692_v27, %v1649_v33 }
 0x5a7   : > { %2180 = vmatprep.subr.bf16.mxu0 %v2465_v19 }
 0x5aa   : > { %2181 = vmatpush3.bf16.msra.mxu0 %v2058_v32 }
 0x5ac   : > { %v1542_v41 = vld [vmem:[#allocation4] sm:$0xff]  ;;  %v1543_v42 = vld [vmem:[#allocation4 + $0x8] sm:$0xff] }
 0x5ad   : > { %v1544_v43 = vpack.c.bf16 %v1543_v42, %v1542_v41 }
 0x5af   : > { %2163 = vmatmul.mubr.msk.bf16.vlgmr.msra.gmra.mxu1 %vm454_vm2, %v1544_v43 }
 0x5b0   : > { %2170 = vmatprep.mubr.msk.bf16.mxu1 %vm2466_vm1, %v2465_v19 }
 0x66f   : > { %v1598_v2 = vpop.f32.mrf.mxu1 }
 0x670   : > { %v1599_v3 = vadd.f32 %v1598_v2, %v1548_v5 }
 0x671   : > { %v2164_v44 = vpop.f32.mrf.mxu1 }
 0x672   : > { %v1605_v45 = vadd.f32 %v1599_v3, %v2677_v21 }
 0x673   : > { %v1601_v46 = vpop.f32.mrf.mxu1 }
 0x674   : > { %v1602_v48 = vadd.f32 %v1601_v46, %v1548_v5  ;;  %v1607_v49 = vsel %vm454_vm2, %v1605_v45, 0.0 }
 0x675   : > { %1608 = vadd.xlane.f32.xlu0 %v1607_v49  ;;  %v2165_v50 = vpop.f32.mrf.mxu1 }
 0x676   : > { %v1606_v51 = vadd.f32 %v1602_v48, %v2679_v22  ;;  %v2056_v22 = vcombine.low %v2654_v8, %v2656_v9  ;;  %v1636_v9 = vsub.s32 4, %v2687_v25 }
 0x678   : > { %v1610_v52 = vsel %vm454_vm2, %v1606_v51, 0.0  ;;  %2167 = vmatpush3.bf16.msra.mxu1 %v2056_v22  ;;  %v1637_v20 = vrot.slane %v2692_v27, %v1636_v9 }
 0x679   : > { %1611 = vadd.xlane.f32.xlu0 %v1610_v52  ;;  %2168 = vmatprep.subr.bf16.mxu1 %v2465_v19 }
 0x67c   : > { %2169 = vmatpush3.bf16.msra.mxu1 %v2055_v60 }
 0x6fe   : > { %v1609_v53 = vpop.xlane.xlu0 %1608 }
 0x6ff   : > { %v1614_v58 = vmul.f32 0.03125, %v1609_v53 }
 0x701   : > { %v1616_v59 = vsub.f32 %v1605_v45, %v1614_v58 }
 0x702   : > { %v1612_v54 = vpop.xlane.xlu0 %1611 }
 0x703   : > { %v1615_v55 = vmul.f32 0.03125, %v1612_v54  ;;  %v1618_v61 = vmul.f32 %v1616_v59, %v1616_v59 }
 0x705   : > { %v1617_v62 = vsub.f32 %v1606_v51, %v1615_v55  ;;  %v1620_v21 = vsel %vm454_vm2, %v1618_v61, 0.0 }
 0x706   : > { %1621 = vadd.xlane.f32.xlu1 %v1620_v21 }
 0x707   : > { %v1619_v63 = vmul.f32 %v1617_v62, %v1617_v62 }
 0x709   : > { %v1623_v56 = vsel %vm454_vm2, %v1619_v63, 0.0 }
 0x70a   : > { %1624 = vadd.xlane.f32.xlu1 %v1623_v56 }
 0x78f   : > { %v1622_v35 = vpop.xlane.xlu1 %1621 }
 0x790   : > { %v1626_v0 = vmul.f32 0.03125, %v1622_v35 }
 0x792   : > { %v1628_v1 = vadd.f32 1e-05, %v1626_v0  ;;  %v1813_v0 = vsub.s32 6, %v2687_v25 }
 0x793   : > { %v1625_v37 = vpop.xlane.xlu1 %1624 }
 0x794   : > { %2303 = vrsqrt.f32 %v1628_v1  ;;  %v1627_v18 = vmul.f32 0.03125, %v1625_v37  ;;  %v1819_v1 = vsub.s32 7, %v2687_v25  ;;  %v1814_v37 = vrot.slane %v2692_v27, %v1813_v0 }
 0x796   : > { %v1629_v8 = vadd.f32 1e-05, %v1627_v18 }
 0x798   : > { %2305 = vrsqrt.f32 %v1629_v8  ;;  %v1820_v8 = vrot.slane %v2692_v27, %v1819_v1 }
 0x7a1   : > { %v2304_v6 = vpop.eup %2303 }
 0x7a2   : > { %v1632_v7 = vmul.f32 %v2304_v6, %v1616_v59 }
 0x7a4   : > { %v1638_v29 = vmul.f32 %v1637_v20, %v1632_v7 }
 0x7a5   : > { %v2306_v16 = vpop.eup %2305 }
 0x7a6   : > { %v1633_v17 = vmul.f32 %v2306_v16, %v1617_v62  ;;  %v1644_v30 = vadd.f32 %v1643_v39, %v1638_v29 }
 0x7a8   : > { %v1639_v38 = vmul.f32 %v1637_v20, %v1633_v17 }
 0x7aa   : > { %v1645_v47 = vadd.f32 %v1643_v39, %v1639_v38 }
 0x7ac   : > { %v1646_v24 = vpack.c.bf16 %v1645_v47, %v1644_v30 }
 0x7ae   : > { %2171 = vmatmul.mubr.msk.bf16.vlgmr.msra.gmra.mxu1 %vm454_vm2, %v1646_v24 }
 0x86e   : > { %v1700_v34 = vpop.f32.mrf.mxu1 }
 0x86f   : > { %v1701_v14 = vadd.f32 %v1700_v34, %v1650_v57 }
 0x870   : > { %v2172_v40 = vpop.f32.mrf.mxu1 }
 0x871   : > { %v1707_v43 = vmax.f32 %v1701_v14, 0.0 }
 0x872   : > { %v1703_v15 = vpop.f32.mrf.mxu1 }
 0x873   : > { %v1704_v41 = vadd.f32 %v1703_v15, %v1650_v57 }
 0x874   : > { %v2173_v42 = vpop.f32.mrf.mxu1 }
 0x875   : > { %v1708_v5 = vmax.f32 %v1704_v41, 0.0 }
 0x877   : > { %v1709_v12 = vpack.c.bf16 %v1708_v5, %v1707_v43 }
 0x879   : > { %2183 = vmatmul.mubr.msk.bf16.vlgmr.msra.gmra.mxu0 %vm1738_vm9, %v1709_v12 }
 0x939   : > { %v1776_v11 = vpop.f32.mrf.mxu0 }
 0x93a   : > { %v1777_v19 = vadd.f32 %v1776_v11, %v1713_v10 }
 0x93b   : > { %v2184_v2 = vpop.f32.mrf.mxu0 }
 0x93c   : > { %v1783_v3 = vadd.f32 %v1777_v19, %v1644_v30 }
 0x93d   : > { %v1779_v44 = vpop.f32.mrf.mxu0 }
 0x93e   : > { %v1780_v45 = vadd.f32 %v1779_v44, %v1713_v10  ;;  %v1785_v46 = vsel %vm454_vm2, %v1783_v3, 0.0 }
 0x93f   : > { %1786 = vadd.xlane.f32.xlu0 %v1785_v46  ;;  %v2185_v48 = vpop.f32.mrf.mxu0 }
 0x940   : > { %v1784_v49 = vadd.f32 %v1780_v45, %v1645_v47 }
 0x942   : > { %v1788_v50 = vsel %vm454_vm2, %v1784_v49, 0.0 }
 0x943   : > { %1789 = vadd.xlane.f32.xlu1 %v1788_v50 }
 0x9c8   : > { %v1787_v51 = vpop.xlane.xlu0 %1786 }
 0x9c9   : > { %v1791_v52 = vmul.f32 0.03125, %v1787_v51 }
 0x9cb   : > { %v1793_v53 = vsub.f32 %v1783_v3, %v1791_v52 }
 0x9cc   : > { %v1790_v58 = vpop.xlane.xlu1 %1789 }
 0x9cd   : > { %v1792_v59 = vmul.f32 0.03125, %v1790_v58  ;;  %v1795_v54 = vmul.f32 %v1793_v53, %v1793_v53 }
 0x9cf   : > { %v1794_v55 = vsub.f32 %v1784_v49, %v1792_v59  ;;  %v1797_v61 = vsel %vm454_vm2, %v1795_v54, 0.0 }
 0x9d0   : > { %1798 = vadd.xlane.f32.xlu0 %v1797_v61 }
 0x9d1   : > { %v1796_v62 = vmul.f32 %v1794_v55, %v1794_v55 }
 0x9d3   : > { %v1800_v21 = vsel %vm454_vm2, %v1796_v62, 0.0 }
 0x9d4   : > { %1801 = vadd.xlane.f32.xlu1 %v1800_v21 }
 0xa59   : > { %v1799_v63 = vpop.xlane.xlu0 %1798 }
 0xa5a   : > { %v1803_v56 = vmul.f32 0.03125, %v1799_v63 }
 0xa5c   : > { %v1805_v22 = vadd.f32 1e-05, %v1803_v56 }
 0xa5d   : > { %v1802_v60 = vpop.xlane.xlu1 %1801 }
 0xa5e   : > { %2307 = vrsqrt.f32 %v1805_v22  ;;  %v1804_v36 = vmul.f32 0.03125, %v1802_v60 }
 0xa60   : > { %v1806_v35 = vadd.f32 1e-05, %v1804_v36 }
 0xa62   : > { %2309 = vrsqrt.f32 %v1806_v35 }
 0xa6b   : > { %v2308_v18 = vpop.eup %2307 }
 0xa6c   : > { %v1809_v9 = vmul.f32 %v2308_v18, %v1793_v53 }
 0xa6e   : > { %v1815_v6 = vmul.f32 %v1814_v37, %v1809_v9 }
 0xa6f   : > { %v2310_v7 = vpop.eup %2309 }
 0xa70   : > { %v1821_v20 = vadd.f32 %v1820_v8, %v1815_v6  ;;  %v1810_v23 = vmul.f32 %v2310_v7, %v1794_v55 }
 0xa72   : > { %1823 = vst.msk [vmem:[#allocation2] sm:$0xff] %vm454_vm2, %v1821_v20  ;;  %v1816_v16 = vmul.f32 %v1814_v37, %v1810_v23  ;;  %1828 = sbr.rel (%p2063_p10) target bundleno = 2992 (0xbb0), region = 71 }
 0xa74   : > { %v1822_v17 = vadd.f32 %v1820_v8, %v1816_v16 }
 0xa76   : > { %1824 = vst.msk [vmem:[#allocation2 + $0x8] sm:$0xff] %vm454_vm2, %v1822_v17 }
 0xa77   : > { %v1830_v29 = vsel %vm454_vm2, %v1821_v20, 0.0  ;;  %v1833_v39 = vsel %vm454_vm2, %v1822_v17, 0.0  ;;  %v1829_v43 = vld [vmem:[%s2988_s6] sm:$0x3] }
 0xa78   : > { %1831 = vadd.xlane.f32.xlu0 %v1830_v29  ;;  %v1859_v5 = vrot.slane %v1829_v43, %v440_v26  ;;  %v1865_v10 = vrot.slane %v1829_v43, %v1547_v4 }
 0xa7c   : > { %1834 = vadd.xlane.f32.xlu0 %v1833_v39 }
 0xb01   : > { %v1832_v27 = vpop.xlane.xlu0 %1831 }
 0xb02   : > { %v1836_v38 = vmul.f32 0.03125, %v1832_v27 }
 0xb04   : > { %v1838_v30 = vsub.f32 %v1821_v20, %v1836_v38 }
 0xb05   : > { %v1835_v47 = vpop.xlane.xlu0 %1834 }
 0xb06   : > { %v1837_v24 = vmul.f32 0.03125, %v1835_v47  ;;  %v1840_v31 = vmul.f32 %v1838_v30, %v1838_v30 }
 0xb08   : > { %v1839_v28 = vsub.f32 %v1822_v17, %v1837_v24  ;;  %v1842_v32 = vsel %vm454_vm2, %v1840_v31, 0.0 }
 0xb09   : > { %1843 = vadd.xlane.f32.xlu1 %v1842_v32 }
 0xb0a   : > { %v1841_v33 = vmul.f32 %v1839_v28, %v1839_v28 }
 0xb0c   : > { %v1845_v57 = vsel %vm454_vm2, %v1841_v33, 0.0 }
 0xb0d   : > { %1846 = vadd.xlane.f32.xlu1 %v1845_v57 }
 0xb92   : > { %v1844_v34 = vpop.xlane.xlu1 %1843 }
 0xb93   : > { %v1848_v40 = vmul.f32 0.03125, %v1844_v34 }
 0xb95   : > { %v1850_v14 = vadd.f32 1e-05, %v1848_v40 }
 0xb96   : > { %v1847_v15 = vpop.xlane.xlu1 %1846 }
 0xb97   : > { %2311 = vrsqrt.f32 %v1850_v14  ;;  %v1849_v41 = vmul.f32 0.03125, %v1847_v15 }
 0xb99   : > { %v1851_v42 = vadd.f32 1e-05, %v1849_v41 }
 0xb9b   : > { %2313 = vrsqrt.f32 %v1851_v42 }
 0xba4   : > { %v2312_v12 = vpop.eup %2311 }
 0xba5   : > { %v1854_v13 = vmul.f32 %v2312_v12, %v1838_v30 }
 0xba7   : > { %v1860_v11 = vmul.f32 %v1859_v5, %v1854_v13 }
 0xba8   : > { %v2314_v19 = vpop.eup %2313 }
 0xba9   : > { %v1866_v2 = vadd.f32 %v1865_v10, %v1860_v11  ;;  %v1855_v3 = vmul.f32 %v2314_v19, %v1839_v28 }
 0xbab   : > { %1868 = vst.msk [vmem:[#allocation10] sm:$0xff] %vm454_vm2, %v1866_v2  ;;  %v1861_v44 = vmul.f32 %v1859_v5, %v1855_v3 }
 0xbad   : > { %v1867_v45 = vadd.f32 %v1865_v10, %v1861_v44 }
 0xbaf   : > { %1869 = vst.msk [vmem:[#allocation10 + $0x8] sm:$0xff] %vm454_vm2, %v1867_v45 }
 0xbb0 PF: > { %s2997_s22 = sadd.s32 4294967295, %s2455_s29   ;;  %s2479_s24 = smov [#allocation10]  }
 0xbb1   : > { %p2949_p11 = scmp.eq.s32.totalorder %s2997_s22, 1  ;;  %s1879_s10 = sshll.u32 %s2479_s24, 4  ;;  %s1880_s10 = int_to_ptr.vmem [resolvable:$true] %s1879_s10 }
 0xbb2   : > { %s2369_s30 = scalar_lea.vmem %s1880_s10, 256  ;;  %p2376_p0 = scmp.lt.s32.totalorder %s1880_s10, %s1880_s10 }
 0xbb3   : > { %p2370_p7 = scmp.ne.s32.totalorder %s1880_s10, %s2369_s30  ;;  %p2377_p2 = scmp.lt.s32.totalorder %s2369_s30, %s2369_s30 }
 0xbb5   : > { %p2371_p12 = pnand %p2370_p7, %p2949_p11  ;;  %p2378_p3 = por %p2377_p2, %p2376_p0 }
 0xbb7   : > { %p2372_p13 = pneg %p2371_p12 }
 0xbb9   : > { %p2379_p6 = pnand %p2378_p3, %p2372_p13 }
 0xbbb   : > { %2382 = shalt.err (!%p2379_p6)
}
 0xbbc   : > { %s2480_s15 = smov 128   ;;  %s2481_s8 = smov 8  }
 0xbbd   : > { %2193 = dma.vmem_to_hbm [thread:$0]  (%p2949_p11), %s1880_s10, 256, %s2989_s7, [#allocation7], %s2480_s15, %s2480_s15, %s2481_s8  }
 0xbbe   : > { %2430 = dma.done.wait (%p2949_p11), [#allocation7], 256  }
 0xbbf   : > { %2432 = vsyncadd (%p2949_p11), [#allocation7], 4294967040 }
 0xbc0 PF: > { %s22_s29 = sadd.s32 1, %s2455_s29   ;;  %s2999_s24 = smov %s2439_s25 }
 0xbc1   : > { %p19_p8 = scmp.ge.s32.totalorder %s22_s29, 4   ;;  %s3000_s25 = smov %s2443_s26 }
 0xbc2   : > { %s3001_s26 = smov %s2598_s11  ;;  %s3002_s27 = smov %s2451_s28 }
 0xbc3   : > { %s3003_s28 = smov %s3005_s14  ;;  %21 = sbr.rel (!%p19_p8) target bundleno = 6 (0x6), region = 132 }
 0xbc8   :  { %1895 = vsyncpa [#allocation6], 1 }
 0xbc9   :  { %1897 = vsyncpa [#allocation6 + $0x1], 1 }
 0xbca   :  { %1898 = vsyncpa [#allocation9], 1 }
 0xbcb   :  { %1900 = vsyncpa [#allocation9 + $0x1], 1 }
 0xbcc   :  { %1901 = vsyncpa [#allocation7], 1 }
 0xbcd   :  { %1903 = vsyncpa [#allocation7 + $0x1], 1 }

</bundles_post_ra>
